<compile_context>
chip_gen: v6e
topology: v6e:2x2x1
jax: 0.10.0
libtpu: 0.0.40
codegen_flags: <defaults>
</compile_context>

<pallas_src>
import functools

import jax
import jax.numpy as jnp
from jax import lax
from jax.experimental import pallas as pl
from jax.experimental.pallas import tpu as pltpu

BN_EPS = 1e-5
ALPHA = 0.2  # LeakyReLU slope for the batch_norm=True fc() path

# ---- synthetic sizes (small, internally consistent, lane-dense) -------------
NC_INP_COARSE = 16          # dim of img_feat_coarse
NZ_COARSE = 128             # output of encoder_coarse   (reference: 1024)
NZ_BOX = 128                # output of encoder_bbox     (reference: 1024)
NC_FINE = 128               # dim of roi_img_feat (feat_fine)
NZ_JOINT = NC_FINE + NZ_COARSE + NZ_BOX   # encoder_joint in/out dim (384)


# ----------------------------- Pallas kernel --------------------------------
def _fused_roi_encoder_kernel(*refs, alpha, bbox_flag):
    f32 = jnp.float32
    bf16 = jnp.bfloat16

    if bbox_flag:
        (ids_ref, coarse_in_ref, fine_ref, bbox_ref,
         wc1_ref, bc1_ref, wc2_ref, bc2_ref,
         wb1_ref, bb1_ref, wb2_ref, bb2_ref, wb3_ref, bb3_ref,
         wj1_ref, bj1_ref, wj2_ref, bj2_ref, o_ref) = refs
    else:
        (ids_ref, coarse_in_ref, fine_ref,
         wc1_ref, bc1_ref, wc2_ref, bc2_ref,
         wj1_ref, bj1_ref, wj2_ref, bj2_ref, o_ref) = refs

    def dot_(x, w):
        # bf16 x bf16 -> f32 accumulation on the MXU.
        return jnp.dot(x, w, preferred_element_type=f32)

    def bias_lrelu(acc, b_ref):
        # f32 epilogue (bias + LeakyReLU); activations kept as bf16.
        y = acc + b_ref[...]
        y = jnp.where(y >= 0.0, y, alpha * y)
        return y.astype(bf16)

    # ---- encoder_coarse on the (NI<=2, .) coarse image feature.  Recomputed
    # per row tile: NI rows only, negligible vs. the per-RoI matmuls. ---------
    xc = coarse_in_ref[...]                                 # (NI, NC_INP_COARSE)
    h = bias_lrelu(dot_(xc, wc1_ref[...]), bc1_ref)
    feat_coarse = bias_lrelu(dot_(h, wc2_ref[...]), bc2_ref)        # (NI, NZC)

    num_images = feat_coarse.shape[0]
    nzc = feat_coarse.shape[1]
    nc_fine = fine_ref.shape[1]

    # ---- encoder_joint layer 1: lane-axis concat == sum of row-block matmuls
    fine = fine_ref[...]                                    # (TR, NC_FINE) bf16
    acc = dot_(fine, wj1_ref[0:nc_fine, :])                 # (TR, NZ_JOINT) f32

    # Coarse contribution: push the tiny coarse feature through wj1's coarse
    # row-block ONCE, then select per RoI row (no (TR, NZC) materialization,
    # no (TR x NZC x NZ_JOINT) matmul).
    cj = dot_(feat_coarse, wj1_ref[nc_fine:nc_fine + nzc, :])       # (NI, NZJ)
    ids = ids_ref[...]                                      # (TR, 1) int32
    cj_r = jnp.broadcast_to(cj[0:1, :], acc.shape)
    for im in range(1, num_images):                         # static unroll, NI<=2
        cj_r = jnp.where(ids == im, cj[im:im + 1, :], cj_r)
    acc = acc + cj_r

    if bbox_flag:
        # ---- encoder_bbox: the /480 scaling is folded into wb1 at trace time.
        xb = bbox_ref[...]                                  # (TR, 4) bf16
        h = bias_lrelu(dot_(xb, wb1_ref[...]), bb1_ref)
        h = bias_lrelu(dot_(h, wb2_ref[...]), bb2_ref)
        feat_bbox = bias_lrelu(dot_(h, wb3_ref[...]), bb3_ref)      # (TR, NZB)
        nzb = feat_bbox.shape[1]
        acc = acc + dot_(feat_bbox,
                         wj1_ref[nc_fine + nzc:nc_fine + nzc + nzb, :])

    h = bias_lrelu(acc, bj1_ref)

    # ---- encoder_joint layer 2 ----------------------------------------------
    y = dot_(h, wj2_ref[...]) + bj2_ref[...]
    y = jnp.where(y >= 0.0, y, alpha * y)
    o_ref[...] = y.astype(o_ref.dtype)


# --------------------------- parameter creation ------------------------------
def make_fc_stack(key, nc_inp, nc_out, nlayers):
    """fc_stack(...) raw params. Matches net_init: Linear W ~ N(0, 0.02), b=0.
    BatchNorm1d keeps default init (gamma=1, beta=0, running mean=0, var=1)."""
    layers = []
    for _ in range(nlayers):
        key, kw = jax.random.split(key)
        layers.append(dict(
            w=0.02 * jax.random.normal(kw, (nc_inp, nc_out), jnp.float32),
            b=jnp.zeros((nc_out,), jnp.float32),
            gamma=jnp.ones((nc_out,), jnp.float32),
            beta=jnp.zeros((nc_out,), jnp.float32),
            mean=jnp.zeros((nc_out,), jnp.float32),
            var=jnp.ones((nc_out,), jnp.float32),
        ))
        nc_inp = nc_out
    return layers, key


def make_roi_encoder_params(key):
    enc_coarse, key = make_fc_stack(key, NC_INP_COARSE, NZ_COARSE, 2)
    enc_bbox, key = make_fc_stack(key, 4, NZ_BOX, 3)
    enc_joint, key = make_fc_stack(key, NZ_JOINT, NZ_JOINT, 2)
    return {
        "encoder_coarse": enc_coarse,
        "encoder_bbox": enc_bbox,
        "encoder_joint": enc_joint,
    }


def _fold_bn(layer, eps=BN_EPS, input_scale=1.0):
    """Fold eval-mode BatchNorm1d (and an optional static input scale) into
    (W, b); weights cast to bf16 for the MXU, bias kept f32 for the epilogue."""
    inv = layer["gamma"] * lax.rsqrt(layer["var"] + eps)
    w_f = (layer["w"] * input_scale * inv[None, :]).astype(jnp.bfloat16)
    b_f = ((layer["b"] - layer["mean"]) * inv + layer["beta"])[None, :]
    return w_f, b_f.astype(jnp.float32)


# ------------------------------ forward pass ---------------------------------
def roi_encoder_forward(params, roi_img_feat, img_feat_coarse, rois_bbox,
                        bbox_flag, *, row_tile=256, out_dtype=jnp.float32,
                        single_buffer_weights=False, vmem_limit_bytes=None):
    """JAX/Pallas equivalent of RoiEncoder.forward (single fused, row-tiled kernel).

    roi_img_feat:    (R_total, NC_FINE)
    img_feat_coarse: (num_images, NC_INP_COARSE)
    rois_bbox:       list of (R_i, 4) arrays (rois_inp[i].bbox), len 1 or 2
    bbox_flag:       static python bool
    row_tile:        rows per grid step (128 for v5e, 256-512 v6e, <=256 v7x)
    single_buffer_weights / vmem_limit_bytes: v7x reference-size VMEM budget
        (single-buffer the resident folded weights, raise the scoped limit).
    """
    bf16 = jnp.bfloat16
    counts = [int(b.shape[0]) for b in rois_bbox]
    n_rows = int(roi_img_feat.shape[0])
    assert n_rows == sum(counts)

    img_ids = jnp.concatenate(
        [jnp.full((n, 1), i, jnp.int32) for i, n in enumerate(counts)], axis=0)

    # Fold bias + eval-mode BN into every Linear; fold 1/480 into bbox layer 1.
    wc1, bc1 = _fold_bn(params["encoder_coarse"][0])
    wc2, bc2 = _fold_bn(params["encoder_coarse"][1])
    wj1, bj1 = _fold_bn(params["encoder_joint"][0])
    wj2, bj2 = _fold_bn(params["encoder_joint"][1])
    if bbox_flag:
        wb1, bb1 = _fold_bn(params["encoder_bbox"][0], input_scale=1.0 / 480.0)
        wb2, bb2 = _fold_bn(params["encoder_bbox"][1])
        wb3, bb3 = _fold_bn(params["encoder_bbox"][2])

    nz_joint = int(wj2.shape[1])
    nc_fine = int(roi_img_feat.shape[1])

    # Row tile: multiple of 8 sublanes; pad R so every store is a full tile.
    tr = int(min(row_tile, ((n_rows + 7) // 8) * 8))
    tr = max(8, (tr // 8) * 8)
    r_pad = pl.cdiv(n_rows, tr) * tr

    def pad_rows(x):
        if x.shape[0] == r_pad:
            return x
        return jnp.pad(x, ((0, r_pad - x.shape[0]),) + ((0, 0),) * (x.ndim - 1))

    ids_p = pad_rows(img_ids)                       # padded rows -> image 0
    fine_p = pad_rows(roi_img_feat).astype(bf16)    # stream activations as bf16
    coarse_p = img_feat_coarse.astype(bf16)

    def row_spec(last):
        return pl.BlockSpec((tr, last), lambda r: (r, 0))

    def const_spec(shape):
        nd = len(shape)
        if single_buffer_weights:
            # v7x reference sizes: keep the ~44 MiB of folded bf16 weights in a
            # single resident buffer (double-buffering them would exceed the
            # 64 MiB physical VMEM).
            return pl.BlockSpec(shape, lambda r, nd=nd: (0,) * nd,
                                pipeline_mode=pl.Buffered(1))
        return pl.BlockSpec(shape, lambda r, nd=nd: (0,) * nd)

    if bbox_flag:
        bbox_all = (rois_bbox[0] if len(rois_bbox) == 1
                    else jnp.concatenate(rois_bbox, axis=0))
        bbox_p = pad_rows(bbox_all).astype(bf16)
        args = (ids_p, coarse_p, fine_p, bbox_p,
                wc1, bc1, wc2, bc2,
                wb1, bb1, wb2, bb2, wb3, bb3,
                wj1, bj1, wj2, bj2)
        in_specs = [row_spec(1), const_spec(coarse_p.shape),
                    row_spec(nc_fine), row_spec(4)]
        in_specs += [const_spec(a.shape) for a in args[4:]]
    else:
        # TODO(synk): reference module sizes encoder_joint as fine+coarse+box;
        # with bbox_flag=False the bbox rows of wj1 are simply skipped here.
        args = (ids_p, coarse_p, fine_p,
                wc1, bc1, wc2, bc2,
                wj1, bj1, wj2, bj2)
        in_specs = [row_spec(1), const_spec(coarse_p.shape), row_spec(nc_fine)]
        in_specs += [const_spec(a.shape) for a in args[3:]]

    out = pl.pallas_call(
        functools.partial(_fused_roi_encoder_kernel,
                          alpha=ALPHA, bbox_flag=bbox_flag),
        out_shape=jax.ShapeDtypeStruct((r_pad, nz_joint), out_dtype),
        grid=(r_pad // tr,),
        in_specs=in_specs,
        out_specs=pl.BlockSpec((tr, nz_joint), lambda r: (r, 0)),
        compiler_params=pltpu.CompilerParams(
            dimension_semantics=("parallel",),
            vmem_limit_bytes=vmem_limit_bytes),
    )(*args)
    return out[:n_rows]


# ------------------------- pure-JAX f32 reference ----------------------------
def _reference_forward(params, roi_img_feat, img_feat_coarse, rois_bbox, bbox_flag):
    def stack(x, layers):
        for l in layers:
            x = x @ l["w"] + l["b"]
            x = (x - l["mean"]) * lax.rsqrt(l["var"] + BN_EPS) * l["gamma"] + l["beta"]
            x = jnp.where(x >= 0.0, x, ALPHA * x)
        return x

    feat_coarse = stack(img_feat_coarse, params["encoder_coarse"])
    counts = [int(b.shape[0]) for b in rois_bbox]
    coarse_rep = jnp.concatenate(
        [jnp.tile(feat_coarse[i:i + 1], (counts[i], 1)) for i in range(len(rois_bbox))],
        axis=0)
    bbox_all = (rois_bbox[0] if len(rois_bbox) == 1
                else jnp.concatenate(rois_bbox, axis=0))
    feat_bbox = stack(bbox_all / 480.0, params["encoder_bbox"])
    if bbox_flag:
        x = jnp.concatenate([roi_img_feat, coarse_rep, feat_bbox], axis=1)
    else:
        x = jnp.concatenate([roi_img_feat, coarse_rep], axis=1)
    return stack(x, params["encoder_joint"])


# ----------------------------------- main ------------------------------------
if __name__ == "__main__":
    key = jax.random.PRNGKey(0)
    kp, k1, k2, k3, k4 = jax.random.split(key, 5)

    params = make_roi_encoder_params(kp)

    # Two images, 48 and 80 RoIs -> 128 RoI rows; row_tile=32 exercises the
    # parallel row grid (4 tiles) while staying small.
    n_rois = (48, 80)
    r_total = sum(n_rois)

    roi_img_feat = jax.random.normal(k1, (r_total, NC_FINE), jnp.float32)
    img_feat_coarse = jax.random.normal(k2, (2, NC_INP_COARSE), jnp.float32)
    bbox0 = 480.0 * jax.random.uniform(k3, (n_rois[0], 4), jnp.float32)
    bbox1 = 480.0 * jax.random.uniform(k4, (n_rois[1], 4), jnp.float32)
    rois_bbox = [bbox0, bbox1]

    out = roi_encoder_forward(params, roi_img_feat, img_feat_coarse, rois_bbox,
                              bbox_flag=True, row_tile=32)
    out = jax.block_until_ready(out)

    assert out.shape == (r_total, NZ_JOINT), out.shape
    assert bool(jnp.all(jnp.isfinite(out)))

    # Loose parity vs the f32 reference (bf16 weights/activations in the kernel).
    ref = _reference_forward(params, roi_img_feat, img_feat_coarse, rois_bbox, True)
    max_err = float(jnp.max(jnp.abs(out.astype(jnp.float32) - ref)))
    assert max_err < 5e-2, f"max abs err vs f32 reference: {max_err}"

    print("KERNEL_OK")
</pallas_src>

<mosaic_0001>
module attributes {stable_mosaic.version = 11 : i64} {
  func.func @_fused_roi_encoder_kernel(%arg0: i32, %arg1: memref<32x1xi32, #tpu.memory_space<vmem>>, %arg2: memref<2x16xbf16, #tpu.memory_space<vmem>>, %arg3: memref<32x128xbf16, #tpu.memory_space<vmem>>, %arg4: memref<32x4xbf16, #tpu.memory_space<vmem>>, %arg5: memref<16x128xbf16, #tpu.memory_space<vmem>>, %arg6: memref<1x128xf32, #tpu.memory_space<vmem>>, %arg7: memref<128x128xbf16, #tpu.memory_space<vmem>>, %arg8: memref<1x128xf32, #tpu.memory_space<vmem>>, %arg9: memref<4x128xbf16, #tpu.memory_space<vmem>>, %arg10: memref<1x128xf32, #tpu.memory_space<vmem>>, %arg11: memref<128x128xbf16, #tpu.memory_space<vmem>>, %arg12: memref<1x128xf32, #tpu.memory_space<vmem>>, %arg13: memref<128x128xbf16, #tpu.memory_space<vmem>>, %arg14: memref<1x128xf32, #tpu.memory_space<vmem>>, %arg15: memref<384x384xbf16, #tpu.memory_space<vmem>>, %arg16: memref<1x384xf32, #tpu.memory_space<vmem>>, %arg17: memref<384x384xbf16, #tpu.memory_space<vmem>>, %arg18: memref<1x384xf32, #tpu.memory_space<vmem>>, %arg19: memref<32x384xf32, #tpu.memory_space<vmem>>) attributes {dimension_semantics = [#tpu.dimension_semantics<parallel>], iteration_bounds = array<i64: 4>, scalar_prefetch = 0 : i64, scratch_operands = 0 : i64, tpu.core_type = #tpu.core_type<tc>, window_params = [{transform_indices = @transform_0, window_bounds = array<i64: 32, 1>}, {pipeline_mode = #tpu.pipeline_mode<synchronous>, transform_indices = @transform_1, window_bounds = array<i64: 2, 16>}, {transform_indices = @transform_2, window_bounds = array<i64: 32, 128>}, {transform_indices = @transform_3, window_bounds = array<i64: 32, 4>}, {pipeline_mode = #tpu.pipeline_mode<synchronous>, transform_indices = @transform_4, window_bounds = array<i64: 16, 128>}, {pipeline_mode = #tpu.pipeline_mode<synchronous>, transform_indices = @transform_5, window_bounds = array<i64: 1, 128>}, {pipeline_mode = #tpu.pipeline_mode<synchronous>, transform_indices = @transform_6, window_bounds = array<i64: 128, 128>}, {pipeline_mode = #tpu.pipeline_mode<synchronous>, transform_indices = @transform_7, window_bounds = array<i64: 1, 128>}, {pipeline_mode = #tpu.pipeline_mode<synchronous>, transform_indices = @transform_8, window_bounds = array<i64: 4, 128>}, {pipeline_mode = #tpu.pipeline_mode<synchronous>, transform_indices = @transform_9, window_bounds = array<i64: 1, 128>}, {pipeline_mode = #tpu.pipeline_mode<synchronous>, transform_indices = @transform_10, window_bounds = array<i64: 128, 128>}, {pipeline_mode = #tpu.pipeline_mode<synchronous>, transform_indices = @transform_11, window_bounds = array<i64: 1, 128>}, {pipeline_mode = #tpu.pipeline_mode<synchronous>, transform_indices = @transform_12, window_bounds = array<i64: 128, 128>}, {pipeline_mode = #tpu.pipeline_mode<synchronous>, transform_indices = @transform_13, window_bounds = array<i64: 1, 128>}, {pipeline_mode = #tpu.pipeline_mode<synchronous>, transform_indices = @transform_14, window_bounds = array<i64: 384, 384>}, {pipeline_mode = #tpu.pipeline_mode<synchronous>, transform_indices = @transform_15, window_bounds = array<i64: 1, 384>}, {pipeline_mode = #tpu.pipeline_mode<synchronous>, transform_indices = @transform_16, window_bounds = array<i64: 384, 384>}, {pipeline_mode = #tpu.pipeline_mode<synchronous>, transform_indices = @transform_17, window_bounds = array<i64: 1, 384>}, {transform_indices = @transform_18, window_bounds = array<i64: 32, 384>}]} {
    %c0 = arith.constant 0 : index
    %c0_0 = arith.constant 0 : index
    %0 = vector.load %arg2[%c0, %c0_0] : memref<2x16xbf16, #tpu.memory_space<vmem>>, vector<2x16xbf16>
    %c0_1 = arith.constant 0 : index
    %c0_2 = arith.constant 0 : index
    %1 = vector.load %arg5[%c0_1, %c0_2] : memref<16x128xbf16, #tpu.memory_space<vmem>>, vector<16x128xbf16>
    %cst = arith.constant dense<0.000000e+00> : vector<2x128xf32>
    %2 = tpu.matmul %0, %1, %cst {dimension_numbers = #tpu.dot_dimension_numbers<[1], [0], [0], [1], [0, 0, 1, 1], [], []>} : vector<2x16xbf16>, vector<16x128xbf16>, vector<2x128xf32> -> vector<2x128xf32>
    %c0_3 = arith.constant 0 : index
    %c0_4 = arith.constant 0 : index
    %3 = vector.load %arg6[%c0_3, %c0_4] : memref<1x128xf32, #tpu.memory_space<vmem>>, vector<1x128xf32>
    %4 = vector.broadcast %3 : vector<1x128xf32> to vector<2x128xf32>
    %5 = arith.addf %2, %4 : vector<2x128xf32>
    %cst_5 = arith.constant 0.000000e+00 : f32
    %6 = vector.broadcast %cst_5 : f32 to vector<2x128xf32>
    %7 = arith.cmpf oge, %5, %6 : vector<2x128xf32>
    %cst_6 = arith.constant 2.000000e-01 : f32
    %8 = vector.broadcast %cst_6 : f32 to vector<2x128xf32>
    %9 = arith.mulf %8, %5 : vector<2x128xf32>
    %10 = arith.select %7, %5, %9 : vector<2x128xi1>, vector<2x128xf32>
    %11 = arith.truncf %10 : vector<2x128xf32> to vector<2x128xbf16>
    %c0_7 = arith.constant 0 : index
    %c0_8 = arith.constant 0 : index
    %12 = vector.load %arg7[%c0_7, %c0_8] : memref<128x128xbf16, #tpu.memory_space<vmem>>, vector<128x128xbf16>
    %cst_9 = arith.constant dense<0.000000e+00> : vector<2x128xf32>
    %13 = tpu.matmul %11, %12, %cst_9 {dimension_numbers = #tpu.dot_dimension_numbers<[1], [0], [0], [1], [0, 0, 1, 1], [], []>} : vector<2x128xbf16>, vector<128x128xbf16>, vector<2x128xf32> -> vector<2x128xf32>
    %c0_10 = arith.constant 0 : index
    %c0_11 = arith.constant 0 : index
    %14 = vector.load %arg8[%c0_10, %c0_11] : memref<1x128xf32, #tpu.memory_space<vmem>>, vector<1x128xf32>
    %15 = vector.broadcast %14 : vector<1x128xf32> to vector<2x128xf32>
    %16 = arith.addf %13, %15 : vector<2x128xf32>
    %cst_12 = arith.constant 0.000000e+00 : f32
    %17 = vector.broadcast %cst_12 : f32 to vector<2x128xf32>
    %18 = arith.cmpf oge, %16, %17 : vector<2x128xf32>
    %cst_13 = arith.constant 2.000000e-01 : f32
    %19 = vector.broadcast %cst_13 : f32 to vector<2x128xf32>
    %20 = arith.mulf %19, %16 : vector<2x128xf32>
    %21 = arith.select %18, %16, %20 : vector<2x128xi1>, vector<2x128xf32>
    %22 = arith.truncf %21 : vector<2x128xf32> to vector<2x128xbf16>
    %c0_14 = arith.constant 0 : index
    %c0_15 = arith.constant 0 : index
    %23 = vector.load %arg3[%c0_14, %c0_15] : memref<32x128xbf16, #tpu.memory_space<vmem>>, vector<32x128xbf16>
    %c0_16 = arith.constant 0 : index
    %c0_17 = arith.constant 0 : index
    %24 = vector.load %arg15[%c0_16, %c0_17] : memref<384x384xbf16, #tpu.memory_space<vmem>>, vector<128x384xbf16>
    %cst_18 = arith.constant dense<0.000000e+00> : vector<32x384xf32>
    %25 = tpu.matmul %23, %24, %cst_18 {dimension_numbers = #tpu.dot_dimension_numbers<[1], [0], [0], [1], [0, 0, 1, 1], [], []>} : vector<32x128xbf16>, vector<128x384xbf16>, vector<32x384xf32> -> vector<32x384xf32>
    %c128 = arith.constant 128 : index
    %c0_19 = arith.constant 0 : index
    %26 = vector.load %arg15[%c128, %c0_19] : memref<384x384xbf16, #tpu.memory_space<vmem>>, vector<128x384xbf16>
    %cst_20 = arith.constant dense<0.000000e+00> : vector<2x384xf32>
    %27 = tpu.matmul %22, %26, %cst_20 {dimension_numbers = #tpu.dot_dimension_numbers<[1], [0], [0], [1], [0, 0, 1, 1], [], []>} : vector<2x128xbf16>, vector<128x384xbf16>, vector<2x384xf32> -> vector<2x384xf32>
    %c0_21 = arith.constant 0 : index
    %c0_22 = arith.constant 0 : index
    %28 = vector.load %arg1[%c0_21, %c0_22] : memref<32x1xi32, #tpu.memory_space<vmem>>, vector<32x1xi32>
    %29 = vector.extract_strided_slice %27 {offsets = [0, 0], sizes = [1, 384], strides = [1, 1]} : vector<2x384xf32> to vector<1x384xf32>
    %30 = vector.shape_cast %29 : vector<1x384xf32> to vector<1x384xf32>
    %31 = vector.broadcast %30 : vector<1x384xf32> to vector<32x384xf32>
    %c1_i32 = arith.constant 1 : i32
    %32 = vector.broadcast %c1_i32 : i32 to vector<32x1xi32>
    %33 = arith.cmpi eq, %28, %32 : vector<32x1xi32>
    %34 = vector.extract_strided_slice %27 {offsets = [1, 0], sizes = [1, 384], strides = [1, 1]} : vector<2x384xf32> to vector<1x384xf32>
    %35 = vector.shape_cast %33 : vector<32x1xi1> to vector<32x1xi1>
    %36 = vector.broadcast %35 : vector<32x1xi1> to vector<32x384xi1>
    %37 = vector.shape_cast %34 : vector<1x384xf32> to vector<1x384xf32>
    %38 = vector.broadcast %37 : vector<1x384xf32> to vector<32x384xf32>
    %39 = arith.select %36, %38, %31 : vector<32x384xi1>, vector<32x384xf32>
    %40 = arith.addf %25, %39 : vector<32x384xf32>
    %c0_23 = arith.constant 0 : index
    %c0_24 = arith.constant 0 : index
    %41 = vector.load %arg4[%c0_23, %c0_24] : memref<32x4xbf16, #tpu.memory_space<vmem>>, vector<32x4xbf16>
    %c0_25 = arith.constant 0 : index
    %c0_26 = arith.constant 0 : index
    %42 = vector.load %arg9[%c0_25, %c0_26] : memref<4x128xbf16, #tpu.memory_space<vmem>>, vector<4x128xbf16>
    %cst_27 = arith.constant dense<0.000000e+00> : vector<32x128xf32>
    %43 = tpu.matmul %41, %42, %cst_27 {dimension_numbers = #tpu.dot_dimension_numbers<[1], [0], [0], [1], [0, 0, 1, 1], [], []>} : vector<32x4xbf16>, vector<4x128xbf16>, vector<32x128xf32> -> vector<32x128xf32>
    %c0_28 = arith.constant 0 : index
    %c0_29 = arith.constant 0 : index
    %44 = vector.load %arg10[%c0_28, %c0_29] : memref<1x128xf32, #tpu.memory_space<vmem>>, vector<1x128xf32>
    %45 = vector.broadcast %44 : vector<1x128xf32> to vector<32x128xf32>
    %46 = arith.addf %43, %45 : vector<32x128xf32>
    %cst_30 = arith.constant 0.000000e+00 : f32
    %47 = vector.broadcast %cst_30 : f32 to vector<32x128xf32>
    %48 = arith.cmpf oge, %46, %47 : vector<32x128xf32>
    %cst_31 = arith.constant 2.000000e-01 : f32
    %49 = vector.broadcast %cst_31 : f32 to vector<32x128xf32>
    %50 = arith.mulf %49, %46 : vector<32x128xf32>
    %51 = arith.select %48, %46, %50 : vector<32x128xi1>, vector<32x128xf32>
    %52 = arith.truncf %51 : vector<32x128xf32> to vector<32x128xbf16>
    %c0_32 = arith.constant 0 : index
    %c0_33 = arith.constant 0 : index
    %53 = vector.load %arg11[%c0_32, %c0_33] : memref<128x128xbf16, #tpu.memory_space<vmem>>, vector<128x128xbf16>
    %cst_34 = arith.constant dense<0.000000e+00> : vector<32x128xf32>
    %54 = tpu.matmul %52, %53, %cst_34 {dimension_numbers = #tpu.dot_dimension_numbers<[1], [0], [0], [1], [0, 0, 1, 1], [], []>} : vector<32x128xbf16>, vector<128x128xbf16>, vector<32x128xf32> -> vector<32x128xf32>
    %c0_35 = arith.constant 0 : index
    %c0_36 = arith.constant 0 : index
    %55 = vector.load %arg12[%c0_35, %c0_36] : memref<1x128xf32, #tpu.memory_space<vmem>>, vector<1x128xf32>
    %56 = vector.broadcast %55 : vector<1x128xf32> to vector<32x128xf32>
    %57 = arith.addf %54, %56 : vector<32x128xf32>
    %cst_37 = arith.constant 0.000000e+00 : f32
    %58 = vector.broadcast %cst_37 : f32 to vector<32x128xf32>
    %59 = arith.cmpf oge, %57, %58 : vector<32x128xf32>
    %cst_38 = arith.constant 2.000000e-01 : f32
    %60 = vector.broadcast %cst_38 : f32 to vector<32x128xf32>
    %61 = arith.mulf %60, %57 : vector<32x128xf32>
    %62 = arith.select %59, %57, %61 : vector<32x128xi1>, vector<32x128xf32>
    %63 = arith.truncf %62 : vector<32x128xf32> to vector<32x128xbf16>
    %c0_39 = arith.constant 0 : index
    %c0_40 = arith.constant 0 : index
    %64 = vector.load %arg13[%c0_39, %c0_40] : memref<128x128xbf16, #tpu.memory_space<vmem>>, vector<128x128xbf16>
    %cst_41 = arith.constant dense<0.000000e+00> : vector<32x128xf32>
    %65 = tpu.matmul %63, %64, %cst_41 {dimension_numbers = #tpu.dot_dimension_numbers<[1], [0], [0], [1], [0, 0, 1, 1], [], []>} : vector<32x128xbf16>, vector<128x128xbf16>, vector<32x128xf32> -> vector<32x128xf32>
    %c0_42 = arith.constant 0 : index
    %c0_43 = arith.constant 0 : index
    %66 = vector.load %arg14[%c0_42, %c0_43] : memref<1x128xf32, #tpu.memory_space<vmem>>, vector<1x128xf32>
    %67 = vector.broadcast %66 : vector<1x128xf32> to vector<32x128xf32>
    %68 = arith.addf %65, %67 : vector<32x128xf32>
    %cst_44 = arith.constant 0.000000e+00 : f32
    %69 = vector.broadcast %cst_44 : f32 to vector<32x128xf32>
    %70 = arith.cmpf oge, %68, %69 : vector<32x128xf32>
    %cst_45 = arith.constant 2.000000e-01 : f32
    %71 = vector.broadcast %cst_45 : f32 to vector<32x128xf32>
    %72 = arith.mulf %71, %68 : vector<32x128xf32>
    %73 = arith.select %70, %68, %72 : vector<32x128xi1>, vector<32x128xf32>
    %74 = arith.truncf %73 : vector<32x128xf32> to vector<32x128xbf16>
    %c256 = arith.constant 256 : index
    %c0_46 = arith.constant 0 : index
    %75 = vector.load %arg15[%c256, %c0_46] : memref<384x384xbf16, #tpu.memory_space<vmem>>, vector<128x384xbf16>
    %cst_47 = arith.constant dense<0.000000e+00> : vector<32x384xf32>
    %76 = tpu.matmul %74, %75, %cst_47 {dimension_numbers = #tpu.dot_dimension_numbers<[1], [0], [0], [1], [0, 0, 1, 1], [], []>} : vector<32x128xbf16>, vector<128x384xbf16>, vector<32x384xf32> -> vector<32x384xf32>
    %77 = arith.addf %40, %76 : vector<32x384xf32>
    %c0_48 = arith.constant 0 : index
    %c0_49 = arith.constant 0 : index
    %78 = vector.load %arg16[%c0_48, %c0_49] : memref<1x384xf32, #tpu.memory_space<vmem>>, vector<1x384xf32>
    %79 = vector.broadcast %78 : vector<1x384xf32> to vector<32x384xf32>
    %80 = arith.addf %77, %79 : vector<32x384xf32>
    %cst_50 = arith.constant 0.000000e+00 : f32
    %81 = vector.broadcast %cst_50 : f32 to vector<32x384xf32>
    %82 = arith.cmpf oge, %80, %81 : vector<32x384xf32>
    %cst_51 = arith.constant 2.000000e-01 : f32
    %83 = vector.broadcast %cst_51 : f32 to vector<32x384xf32>
    %84 = arith.mulf %83, %80 : vector<32x384xf32>
    %85 = arith.select %82, %80, %84 : vector<32x384xi1>, vector<32x384xf32>
    %86 = arith.truncf %85 : vector<32x384xf32> to vector<32x384xbf16>
    %c0_52 = arith.constant 0 : index
    %c0_53 = arith.constant 0 : index
    %87 = vector.load %arg17[%c0_52, %c0_53] : memref<384x384xbf16, #tpu.memory_space<vmem>>, vector<384x384xbf16>
    %cst_54 = arith.constant dense<0.000000e+00> : vector<32x384xf32>
    %88 = tpu.matmul %86, %87, %cst_54 {dimension_numbers = #tpu.dot_dimension_numbers<[1], [0], [0], [1], [0, 0, 1, 1], [], []>} : vector<32x384xbf16>, vector<384x384xbf16>, vector<32x384xf32> -> vector<32x384xf32>
    %c0_55 = arith.constant 0 : index
    %c0_56 = arith.constant 0 : index
    %89 = vector.load %arg18[%c0_55, %c0_56] : memref<1x384xf32, #tpu.memory_space<vmem>>, vector<1x384xf32>
    %90 = vector.broadcast %89 : vector<1x384xf32> to vector<32x384xf32>
    %91 = arith.addf %88, %90 : vector<32x384xf32>
    %cst_57 = arith.constant 0.000000e+00 : f32
    %92 = vector.broadcast %cst_57 : f32 to vector<32x384xf32>
    %93 = arith.cmpf oge, %91, %92 : vector<32x384xf32>
    %cst_58 = arith.constant 2.000000e-01 : f32
    %94 = vector.broadcast %cst_58 : f32 to vector<32x384xf32>
    %95 = arith.mulf %94, %91 : vector<32x384xf32>
    %96 = arith.select %93, %91, %95 : vector<32x384xi1>, vector<32x384xf32>
    %c0_59 = arith.constant 0 : index
    %c0_60 = arith.constant 0 : index
    %97 = vector.load %arg19[%c0_59, %c0_60] : memref<32x384xf32, #tpu.memory_space<vmem>>, vector<32x384xf32>
    tpu.vector_store %arg19[%c0_59, %c0_60], %96 {strides = array<i32>} : memref<32x384xf32, #tpu.memory_space<vmem>>, vector<32x384xf32>,
    return
  }
  func.func @transform_0(%arg0: i32) -> (i32, i32) {
    %c0_i32 = arith.constant 0 : i32
    %c0_i32_0 = arith.constant 0 : i32
    return %arg0, %c0_i32 : i32, i32
  }
  func.func @transform_1(%arg0: i32) -> (i32, i32) {
    %c0_i32 = arith.constant 0 : i32
    %c0_i32_0 = arith.constant 0 : i32
    %c0_i32_1 = arith.constant 0 : i32
    return %c0_i32, %c0_i32_0 : i32, i32
  }
  func.func @transform_2(%arg0: i32) -> (i32, i32) {
    %c0_i32 = arith.constant 0 : i32
    %c0_i32_0 = arith.constant 0 : i32
    return %arg0, %c0_i32 : i32, i32
  }
  func.func @transform_3(%arg0: i32) -> (i32, i32) {
    %c0_i32 = arith.constant 0 : i32
    %c0_i32_0 = arith.constant 0 : i32
    return %arg0, %c0_i32 : i32, i32
  }
  func.func @transform_4(%arg0: i32) -> (i32, i32) {
    %c0_i32 = arith.constant 0 : i32
    %c0_i32_0 = arith.constant 0 : i32
    %c0_i32_1 = arith.constant 0 : i32
    return %c0_i32, %c0_i32_0 : i32, i32
  }
  func.func @transform_5(%arg0: i32) -> (i32, i32) {
    %c0_i32 = arith.constant 0 : i32
    %c0_i32_0 = arith.constant 0 : i32
    %c0_i32_1 = arith.constant 0 : i32
    return %c0_i32, %c0_i32_0 : i32, i32
  }
  func.func @transform_6(%arg0: i32) -> (i32, i32) {
    %c0_i32 = arith.constant 0 : i32
    %c0_i32_0 = arith.constant 0 : i32
    %c0_i32_1 = arith.constant 0 : i32
    return %c0_i32, %c0_i32_0 : i32, i32
  }
  func.func @transform_7(%arg0: i32) -> (i32, i32) {
    %c0_i32 = arith.constant 0 : i32
    %c0_i32_0 = arith.constant 0 : i32
    %c0_i32_1 = arith.constant 0 : i32
    return %c0_i32, %c0_i32_0 : i32, i32
  }
  func.func @transform_8(%arg0: i32) -> (i32, i32) {
    %c0_i32 = arith.constant 0 : i32
    %c0_i32_0 = arith.constant 0 : i32
    %c0_i32_1 = arith.constant 0 : i32
    return %c0_i32, %c0_i32_0 : i32, i32
  }
  func.func @transform_9(%arg0: i32) -> (i32, i32) {
    %c0_i32 = arith.constant 0 : i32
    %c0_i32_0 = arith.constant 0 : i32
    %c0_i32_1 = arith.constant 0 : i32
    return %c0_i32, %c0_i32_0 : i32, i32
  }
  func.func @transform_10(%arg0: i32) -> (i32, i32) {
    %c0_i32 = arith.constant 0 : i32
    %c0_i32_0 = arith.constant 0 : i32
    %c0_i32_1 = arith.constant 0 : i32
    return %c0_i32, %c0_i32_0 : i32, i32
  }
  func.func @transform_11(%arg0: i32) -> (i32, i32) {
    %c0_i32 = arith.constant 0 : i32
    %c0_i32_0 = arith.constant 0 : i32
    %c0_i32_1 = arith.constant 0 : i32
    return %c0_i32, %c0_i32_0 : i32, i32
  }
  func.func @transform_12(%arg0: i32) -> (i32, i32) {
    %c0_i32 = arith.constant 0 : i32
    %c0_i32_0 = arith.constant 0 : i32
    %c0_i32_1 = arith.constant 0 : i32
    return %c0_i32, %c0_i32_0 : i32, i32
  }
  func.func @transform_13(%arg0: i32) -> (i32, i32) {
    %c0_i32 = arith.constant 0 : i32
    %c0_i32_0 = arith.constant 0 : i32
    %c0_i32_1 = arith.constant 0 : i32
    return %c0_i32, %c0_i32_0 : i32, i32
  }
  func.func @transform_14(%arg0: i32) -> (i32, i32) {
    %c0_i32 = arith.constant 0 : i32
    %c0_i32_0 = arith.constant 0 : i32
    %c0_i32_1 = arith.constant 0 : i32
    return %c0_i32, %c0_i32_0 : i32, i32
  }
  func.func @transform_15(%arg0: i32) -> (i32, i32) {
    %c0_i32 = arith.constant 0 : i32
    %c0_i32_0 = arith.constant 0 : i32
    %c0_i32_1 = arith.constant 0 : i32
    return %c0_i32, %c0_i32_0 : i32, i32
  }
  func.func @transform_16(%arg0: i32) -> (i32, i32) {
    %c0_i32 = arith.constant 0 : i32
    %c0_i32_0 = arith.constant 0 : i32
    %c0_i32_1 = arith.constant 0 : i32
    return %c0_i32, %c0_i32_0 : i32, i32
  }
  func.func @transform_17(%arg0: i32) -> (i32, i32) {
    %c0_i32 = arith.constant 0 : i32
    %c0_i32_0 = arith.constant 0 : i32
    %c0_i32_1 = arith.constant 0 : i32
    return %c0_i32, %c0_i32_0 : i32, i32
  }
  func.func @transform_18(%arg0: i32) -> (i32, i32) {
    %c0_i32 = arith.constant 0 : i32
    %c0_i32_0 = arith.constant 0 : i32
    return %arg0, %c0_i32 : i32, i32
  }
}

</mosaic_0001>

<bundles_post_ra>
// kernel: tpu_custom_call.1
= control target key start
LH: loop header
LB: loop body
LE: loop exit
PB: predicated region body
PF: predicated region fallthrough
CT: control target
= control target key end

     0   :  { %s4678_s0 = inlined_call_operand.vmem [shape: s32[128,1], index: 0, kind: input, shape index: {}]   ;;  %s4679_s1 = inlined_call_operand.hbm [shape: bf16[2,16], index: 1, kind: input, shape index: {}]   ;;  %s4680_s2 = inlined_call_operand.vmem [shape: bf16[128,128], index: 2, kind: input, shape index: {}]   ;;  %s4681_s3 = inlined_call_operand.vmem [shape: bf16[128,4], index: 3, kind: input, shape index: {}]   ;;  %s4682_s4 = inlined_call_operand.vmem [shape: bf16[16,128], index: 4, kind: input, shape index: {}]   ;;  %s4683_s5 = inlined_call_operand.hbm [shape: f32[1,128], index: 5, kind: input, shape index: {}]   ;;  %s4684_s6 = inlined_call_operand.vmem [shape: bf16[128,128], index: 6, kind: input, shape index: {}]   ;;  %s4685_s7 = inlined_call_operand.hbm [shape: f32[1,128], index: 7, kind: input, shape index: {}]   ;;  %s4686_s8 = inlined_call_operand.vmem [shape: bf16[4,128], index: 8, kind: input, shape index: {}]   ;;  %s4687_s9 = inlined_call_operand.vmem [shape: f32[1,128], index: 9, kind: input, shape index: {}]   ;;  %s4688_s10 = inlined_call_operand.vmem [shape: bf16[128,128], index: 10, kind: input, shape index: {}]   ;;  %s4689_s11 = inlined_call_operand.vmem [shape: f32[1,128], index: 11, kind: input, shape index: {}]   ;;  %s4690_s12 = inlined_call_operand.hbm [shape: bf16[128,128], index: 12, kind: input, shape index: {}]   ;;  %s4691_s13 = inlined_call_operand.vmem [shape: f32[1,128], index: 13, kind: input, shape index: {}]   ;;  %s4692_s14 = inlined_call_operand.hbm [shape: bf16[384,384], index: 14, kind: input, shape index: {}]   ;;  %s4693_s15 = inlined_call_operand.vmem [shape: f32[1,384], index: 15, kind: input, shape index: {}]   ;;  %s4694_s16 = inlined_call_operand.hbm [shape: bf16[384,384], index: 16, kind: input, shape index: {}]   ;;  %s4695_s17 = inlined_call_operand.vmem [shape: f32[1,384], index: 17, kind: input, shape index: {}]   ;;  %s4696_s18 = inlined_call_operand.hbm [shape: f32[128,384], index: 18, kind: output, shape index: {}]  }
   0x1   :  { %4707 = sst [smem:[#allocation25_spill]] %s4678_s0 }
   0x2   :  { %4708 = sst [smem:[#allocation26_spill]] %s4679_s1 }
   0x3   :  { %4709 = sst [smem:[#allocation27_spill]] %s4680_s2 }
   0x4   :  { %4710 = sst [smem:[#allocation28_spill]] %s4683_s5 }
   0x5   :  { %4711 = sst [smem:[#allocation29_spill]] %s4696_s18 }
   0x6   :  { %23 = vsyncpa [#allocation3], 0 }
   0x7   :  { %24 = vsyncpa [#allocation6], 0 }
   0x8   :  { %25 = vsyncpa [#allocation9], 0 }
   0x9   :  { %26 = vsyncpa [#allocation12], 0 }
   0xa   :  { %27 = vsyncpa [#allocation4], 0 }
   0xb   :  { %29 = vsyncpa [#allocation4 + $0x1], 0  ;;  %s4226_s27 = smov 0   ;;  %s4228_s28 = smov 0  }
   0xc   :  { %s4230_s29 = smov 0   ;;  %s4232_s30 = smov 0  }
   0xd LB: > { %4712 = sst [smem:[#allocation19_spill]] %s4101_s27  ;;  %s4247_s0 = sadd.s32 4294967295, %s4113_s30   ;;  %s4113_s30 = sphi %s4232_s30, %s4742_s30   ;;  %s4109_s29 = sphi %s4230_s29, %s4744_s29   ;;  %s4105_s28 = sphi %s4228_s28, %s4746_s28   ;;  %s4101_s27 = sphi %s4226_s27, %s4745_s27  }
   0xe   : > { %4713 = sst [smem:[#allocation20_spill]] %s4109_s29  ;;  %s3085_s19 = sadd.s32 4294967294, %s4113_s30  }
   0xf   : > { %4714 = sst [smem:[#allocation21_spill]] %s4113_s30  ;;  %s4251_s1 = sadd.s32 1, %s4113_s30  }
  0x10   : > { %4715 = sst [smem:[#allocation22_spill]] %s4251_s1  ;;  %s435_s20 = sadd.s32 1, %s4109_s29 }
  0x11   : > { %s432_s21 = ssub.s32 %s4113_s30, %s4251_s1  ;;  %p445_p0 = scmp.ne.s32.totalorder %s4109_s29, %s4105_s28 }
  0x12   : > { %p433_p1 = scmp.eq.s32.totalorder %s432_s21, 0  ;;  %p446_p2 = scmp.eq.s32.totalorder %s4247_s0, 3 }
  0x13   : > { %p451_p3 = scmp.ne.s32.totalorder %s4105_s28, %s4101_s27  ;;  %p452_p4 = scmp.eq.s32.totalorder %s3085_s19, 3 }
  0x14   : > { %s4262_s22 = scalar_select %p433_p1, %s4109_s29, %s435_s20  }
  0x15   : > { %p4264_p5 = por %p446_p2, %p445_p0  ;;  %p4268_p6 = por %p452_p4, %p451_p3 }
  0x16   : > { %4716 = sst [smem:[#allocation23_spill]] %s4262_s22  ;;  %p3086_p7 = scmp.ge.s32.totalorder %s4113_s30, 1 }
  0x17   : > { %s4717_s2 = scalar_select %p4264_p5, 1, 0 }
  0x18   : > { %s4718_s23 = scalar_select %p4268_p6, 1, 0 }
  0x19   : > { %p459_p8 = scmp.lt.s32.totalorder %s4113_s30, 5  ;;  %p4702_p9 = scmp.eq.s32.totalorder %s4247_s0, 0 }
  0x1a   : > { %4719 = sst [smem:[#allocation24_spill]] %s4718_s23  ;;  %s4115_s25 = smov [#allocation5]  }
  0x1b   : > { %p4275_p10 = pnand %p3086_p7, %p459_p8  ;;  %s486_s26 = sshll.u32 %s4115_s25, 4  ;;  %s487_s26 = int_to_ptr.vmem [resolvable:$true] %s486_s26 }
  0x1c   : > { %s4116_s19 = smov [#allocation8]   ;;  %s4117_s22 = smov [#allocation2]  }
  0x1d   : > { %s4720_s24 = scalar_select %p4275_p10, 1, 0 }
  0x1e   : > { %p3575_p11 = pneg %p4275_p10  ;;  %s522_s20 = sshll.u32 %s4116_s19, 4  ;;  %s4287_s20 = int_to_ptr.vmem [resolvable:$true] %s522_s20 }
  0x1f   : > { %s472_s29 = sshll.u32 %s4117_s22, 4  ;;  %s3892_s25 = scalar_lea.vmem %s487_s26, 16  ;;  %s473_s29 = int_to_ptr.vmem [resolvable:$true] %s472_s29 }
  0x20   : > { %p4283_p12 = pnand %p4702_p9, %p3575_p11  ;;  %p3893_p0 = scmp.ne.s32.totalorder %s487_s26, %s3892_s25 }
  0x21   : > { %s3899_s19 = scalar_lea.vmem %s487_s26, 32  ;;  %p3900_p3 = scmp.lt.s32.totalorder %s487_s26, %s487_s26 }
  0x22   : > { %p4291_p13 = pneg %p4283_p12  ;;  %p3901_p4 = scmp.lt.s32.totalorder %s3899_s19, %s3892_s25 }
  0x24   : > { %p3895_p1 = pnand %p3893_p0, %p4291_p13  ;;  %p3902_p7 = por %p3901_p4, %p3900_p3 }
  0x26   : > { %p3896_p2 = pneg %p3895_p1 }
  0x28   : > { %p3903_p8 = pnand %p3902_p7, %p3896_p2 }
  0x2a   : > { %3906 = shalt.err (!%p3903_p8)
}
  0x2b   : > { %s4723_s5 = sld [smem:[#allocation28_spill]]  ;;  %s3918_s27 = scalar_lea.vmem %s4287_s20, 1024 }
  0x2c   : > { %p3919_p11 = scmp.ne.s32.totalorder %s4287_s20, %s3918_s27  ;;  %p3926_p9 = scmp.lt.s32.totalorder %s4287_s20, %s4287_s20 }
  0x2d   : > { %p3927_p3 = scmp.lt.s32.totalorder %s3918_s27, %s3918_s27 }
  0x2e   : > { %p3921_p0 = pnand %p3919_p11, %p4291_p13 }
  0x2f   : > { %p3928_p2 = por %p3927_p3, %p3926_p9 }
  0x30   : > { %p3922_p1 = pneg %p3921_p0 }
  0x31   : > { %3581 = dma.hbm_to_vmem [thread:$0]  (!%p4283_p12), %s4723_s5, 16, %s487_s26, [#allocation6]  }
  0x32   : > { %p3929_p4 = pnand %p3928_p2, %p3922_p1 }
  0x34   : > { %3932 = shalt.err (!%p3929_p4)
}
  0x35   : > { %s4118_s25 = smov 64   ;;  %s4119_s23 = smov 4  }
  0x36   : > { %3587 = dma.hbm_to_vmem [thread:$0]  (!%p4283_p12), %s4690_s12, 1024, %s4287_s20, [#allocation9], %s4118_s25, %s4118_s25, %s4119_s23  }
  0x37   : > { %s3944_s26 = scalar_lea.vmem %s473_s29, 16  ;;  %s3951_s27 = scalar_lea.vmem %s473_s29, 32 }
  0x38   : > { %p3945_p7 = scmp.ne.s32.totalorder %s473_s29, %s3944_s26  ;;  %p3952_p9 = scmp.lt.s32.totalorder %s473_s29, %s473_s29 }
  0x39   : > { %p3953_p0 = scmp.lt.s32.totalorder %s3951_s27, %s3944_s26 }
  0x3a   : > { %p3947_p8 = pnand %p3945_p7, %p4291_p13 }
  0x3b   : > { %p3954_p1 = por %p3953_p0, %p3952_p9 }
  0x3c   : > { %p3948_p11 = pneg %p3947_p8 }
  0x3e   : > { %p3955_p3 = pnand %p3954_p1, %p3948_p11 }
  0x40   : > { %3958 = shalt.err (!%p3955_p3)
}
  0x41   : > { %s4724_s18 = sld [smem:[#allocation26_spill]]  ;;  %s4120_s20 = smov [#allocation7]  }
  0x42   : > { %s500_s25 = sshll.u32 %s4120_s20, 4  ;;  %s4121_s23 = smov [#allocation10]   ;;  %s501_s25 = int_to_ptr.vmem [resolvable:$true] %s500_s25 }
  0x43   : > { %s538_s19 = sshll.u32 %s4121_s23, 4  ;;  %s3970_s22 = scalar_lea.vmem %s501_s25, 16  ;;  %s539_s19 = int_to_ptr.vmem [resolvable:$true] %s538_s19 }
  0x44   : > { %p3971_p2 = scmp.ne.s32.totalorder %s501_s25, %s3970_s22  ;;  %s3977_s26 = scalar_lea.vmem %s501_s25, 32 }
  0x45   : > { %p3978_p8 = scmp.lt.s32.totalorder %s501_s25, %s501_s25  ;;  %p3979_p11 = scmp.lt.s32.totalorder %s3977_s26, %s3970_s22 }
  0x46   : > { %p3973_p4 = pnand %p3971_p2, %p4291_p13 }
  0x47   : > { %3578 = dma.hbm_to_vmem [thread:$0]  (!%p4283_p12), %s4724_s18, 16, %s473_s29, [#allocation3]  }
  0x48   : > { %p3974_p7 = pneg %p3973_p4  ;;  %p3980_p9 = por %p3979_p11, %p3978_p8 }
  0x4a   : > { %p3981_p0 = pnand %p3980_p9, %p3974_p7 }
  0x4c   : > { %3984 = shalt.err (!%p3981_p0)
}
  0x4d   : > { %3584 = dma.hbm_to_vmem [thread:$0]  (!%p4283_p12), %s4685_s7, 16, %s501_s25, [#allocation6]  }
  0x4e   : > { %s3996_s29 = scalar_lea.vmem %s539_s19, 9216  ;;  %p4004_p4 = scmp.lt.s32.totalorder %s539_s19, %s539_s19 }
  0x4f   : > { %p3997_p1 = scmp.ne.s32.totalorder %s539_s19, %s3996_s29  ;;  %p4005_p6 = scmp.lt.s32.totalorder %s3996_s29, %s3996_s29 }
  0x51   : > { %p3999_p3 = pnand %p3997_p1, %p4291_p13  ;;  %p4006_p5 = por %p4005_p6, %p4004_p4 }
  0x53   : > { %p4000_p2 = pneg %p3999_p3 }
  0x55   : > { %p4007_p10 = pnand %p4006_p5, %p4000_p2 }
  0x57   : > { %4010 = shalt.err (!%p4007_p10)
}
  0x58   : > { %s4122_s30 = smov 192   ;;  %s4123_s27 = smov 12  }
  0x59   : > { %3590 = dma.hbm_to_vmem [thread:$0]  (!%p4283_p12), %s4692_s14, 9216, %s539_s19, [#allocation9], %s4122_s30, %s4122_s30, %s4123_s27  }
  0x5a   : > { %s4124_s25 = smov [#allocation11]  }
  0x5b   : > { %s554_s22 = sshll.u32 %s4124_s25, 4  ;;  %s555_s22 = int_to_ptr.vmem [resolvable:$true] %s554_s22 }
  0x5c   : > { %s4022_s26 = scalar_lea.vmem %s555_s22, 9216  ;;  %p4030_p6 = scmp.lt.s32.totalorder %s555_s22, %s555_s22 }
  0x5d   : > { %p4023_p7 = scmp.ne.s32.totalorder %s555_s22, %s4022_s26  ;;  %p4031_p5 = scmp.lt.s32.totalorder %s4022_s26, %s4022_s26 }
  0x5f   : > { %p4025_p8 = pnand %p4023_p7, %p4291_p13  ;;  %p4032_p10 = por %p4031_p5, %p4030_p6 }
  0x61   : > { %p4026_p11 = pneg %p4025_p8 }
  0x63   : > { %p4033_p9 = pnand %p4032_p10, %p4026_p11 }
  0x65   : > { %4036 = shalt.err (!%p4033_p9)
}
  0x66   : > { %3593 = dma.hbm_to_vmem [thread:$0]  (!%p4283_p12), %s4694_s16, 9216, %s555_s22, [#allocation12], %s4122_s30, %s4122_s30, %s4123_s27  }
  0x67   : > { %p4725_p0 = scmp.ne.s32.totalorder %s4720_s24, 0 }
  0x68   : > { %p4726_p1 = scmp.eq.s32.totalorder (!%p4725_p0), %s4247_s0, 0 }
  0x69   : > { %600 = sbr.rel (%p4725_p0) target bundleno = 1664 (0x680), region = 92 }
  0x6e   : > { %4080 = dma.done.wait (%p4726_p1), [#allocation3], 16   ;;  %p4727_p13 = pmov %p4726_p1 }
  0x6f   : > { %p4728_p3 = pmov %p4726_p1 }
  0x70   : > { %4082 = vsyncadd (%p4727_p13), [#allocation3], 4294967280 }
  0x71   : > { %4084 = dma.done.wait (%p4728_p3), [#allocation6], 32   ;;  %p4729_p2 = pmov %p4726_p1 }
  0x72   : > { %p4730_p4 = pmov %p4726_p1 }
  0x73   : > { %4086 = vsyncadd (%p4729_p2), [#allocation6], 4294967264 }
  0x74   : > { %4088 = dma.done.wait (%p4730_p4), [#allocation9], 10240   ;;  %p4731_p12 = pmov %p4726_p1 }
  0x75   : > { %p4732_p7 = pmov %p4726_p1 }
  0x76   : > { %4090 = vsyncadd (%p4731_p12), [#allocation9], 4294957056 }
  0x77   : > { %4092 = dma.done.wait (%p4732_p7), [#allocation12], 9216   ;;  %p4733_p8 = pmov %p4726_p1 }
  0x78   : > { %v4125_v0 = vmov 0.0   ;;  %vm4126_vm0 = vmmov 0   ;;  %v3660_v1 = vld [vmem:[%s4682_s4] sm:$0xff]   ;;  %vm720_vm1 = vcmask 130048   ;;  %v3661_v3 = vld [vmem:[%s4684_s6 + $0x38] sm:$0xff]   ;;  %v3662_v4 = vld [vmem:[%s4684_s6 + $0x30] sm:$0xff]  }
  0x79   : > { %4094 = vsyncadd (%p4733_p8), [#allocation12], 4294958080  ;;  %3394 = vmatprep.subr.bf16.mxu1 %v4125_v0  ;;  %3396 = vmatprep.mubr.msk.bf16.mxu1 %vm4126_vm0, %v4125_v0  ;;  %v704_v2 = vld [vmem:[#allocation2] sm:$0x1]  ;;  %v3663_v5 = vld [vmem:[%s4684_s6 + $0x28] sm:$0xff]   ;;  %v4127_v46 = vmov 0  }
  0x7a   : > { %3395 = vmatpush3.bf16.msra.mxu1 %v3660_v1  ;;  %v3664_v6 = vld [vmem:[%s4684_s6 + $0x20] sm:$0xff]   ;;  %v3665_v7 = vld [vmem:[%s4684_s6 + $0x18] sm:$0xff]   ;;  %v3666_v8 = vld [vmem:[%s4684_s6 + $0x10] sm:$0xff]   ;;  %1111 = vmatprep.mubr.bf16.mxu0 %v4127_v46  ;;  %s3101_s29 = sshll.u32 %s4247_s0, 2  ;;  %s4734_s23 = sld [smem:[#allocation27_spill]]  ;;  %vm1495_vm8 = vcmask 1041408  }
  0x7b   : > { %3400 = vmatprep.subr.bf16.mxu1 %v4125_v0  ;;  %v3667_v9 = vld [vmem:[%s4684_s6 + $0x8] sm:$0xff]   ;;  %v3668_v10 = vld [vmem:[%s4684_s6] sm:$0xff]   ;;  %3659 = vset.pattern.permute.xlu1 %v4127_v46  ;;  %p685_p11 = scmp.lt.s32.totalorder %s3101_s29, 15  ;;  %s4735_s21 = sld [smem:[#allocation25_spill]]  ;;  %vm1488_vm9 = vcmask 31744  }
  0x7c   : > { %v3669_v11 = vld [vmem:[#allocation10 + $0x16c] ss:$12 sps:$4 sm:$0xff]   ;;  %v3671_v12 = vld [vmem:[#allocation10 + $0x168] ss:$12 sps:$4 sm:$0xff]   ;;  %v3675_v14 = vld [vmem:[#allocation10 + $0x150] ss:$12 sps:$4 sm:$0xff]   ;;  %3658 = vset.pattern.permute.xlu0 %v4127_v46 }
  0x7d   : > { %3397 = vmatmul.mubr.msk.bf16.vlgmr.msra.gmra.mxu1 %vm720_vm1, %v704_v2  ;;  %v3673_v13 = vld [vmem:[#allocation10 + $0x154] ss:$12 sps:$4 sm:$0xff]   ;;  %1079 = vmatprep.subr.bf16.mxu0 %v3669_v11  ;;  %v3677_v15 = vld [vmem:[#allocation10 + $0x13c] ss:$12 sps:$4 sm:$0xff]   ;;  %v3679_v16 = vld [vmem:[#allocation10 + $0x138] ss:$12 sps:$4 sm:$0xff]  }
  0x7e   : > { %3401 = vmatpush3.bf16.msra.mxu1 %v3661_v3  ;;  %3416 = vmatprep.mubr.msk.bf16.mxu1 %vm4126_vm0, %v4125_v0  ;;  %v3681_v17 = vld [vmem:[#allocation10 + $0x124] ss:$12 sps:$4 sm:$0xff]   ;;  %v3683_v18 = vld [vmem:[#allocation10 + $0x120] ss:$12 sps:$4 sm:$0xff]   ;;  %v3687_v20 = vld [vmem:[#allocation10 + $0x108] ss:$12 sps:$4 sm:$0xff]  }
  0x7f   : > { %3402 = vmatprep.subr.bf16.mxu1 %v4125_v0  ;;  %1080 = vmatpush1.bf16.msra.mxu0 %v3671_v12  ;;  %v3685_v19 = vld [vmem:[#allocation10 + $0x10c] ss:$12 sps:$4 sm:$0xff]   ;;  %v3689_v21 = vld [vmem:[#allocation10 + $0xf4] ss:$12 sps:$4 sm:$0xff]   ;;  %v3691_v22 = vld [vmem:[#allocation10 + $0xf0] ss:$12 sps:$4 sm:$0xff]  }
  0x80   : > { %1081 = vmatprep.subr.bf16.mxu0 %v3673_v13  ;;  %v3693_v23 = vld [vmem:[#allocation10 + $0xdc] ss:$12 sps:$4 sm:$0xff]   ;;  %v3676_v34 = vld [vmem:[#allocation10 + $0x158] ss:$12 sps:$4 sm:$0xff]   ;;  %v3680_v35 = vld [vmem:[#allocation10 + $0x140] ss:$12 sps:$4 sm:$0xff]  }
  0x81   : > { %v3107_v24 = vld [vmem:[#allocation5] ss:$0 sm:$0xff]  ;;  %v3684_v36 = vld [vmem:[#allocation10 + $0x128] ss:$12 sps:$4 sm:$0xff]   ;;  %v3692_v38 = vld [vmem:[#allocation10 + $0xf8] ss:$12 sps:$4 sm:$0xff]  }
  0x82   : > { %3403 = vmatpush3.bf16.msra.mxu1 %v3662_v4  ;;  %v3672_v31 = vld [vmem:[#allocation10 + $0x170] ss:$12 sps:$4 sm:$0xff]   ;;  %v3695_v39 = vld [vmem:[#allocation10 + $0xd8] ss:$12 sps:$4 sm:$0xff]   ;;  %v3696_v40 = vld [vmem:[#allocation10 + $0xe0] ss:$12 sps:$4 sm:$0xff]  }
  0x83   : > { %3404 = vmatprep.subr.bf16.mxu1 %v4125_v0  ;;  %1082 = vmatpush1.bf16.msra.mxu0 %v3675_v14  ;;  %v3688_v37 = vld [vmem:[#allocation10 + $0x110] ss:$12 sps:$4 sm:$0xff]   ;;  %v3699_v42 = vld [vmem:[#allocation10 + $0xc0] ss:$12 sps:$4 sm:$0xff]   ;;  %v3700_v43 = vld [vmem:[#allocation10 + $0xc8] ss:$12 sps:$4 sm:$0xff]  }
  0x84   : > { %1083 = vmatprep.subr.bf16.mxu0 %v3677_v15  ;;  %v3697_v41 = vld [vmem:[#allocation10 + $0xc4] ss:$12 sps:$4 sm:$0xff]   ;;  %v3703_v44 = vld [vmem:[#allocation10 + $0xac] ss:$12 sps:$4 sm:$0xff]   ;;  %s4748_s29 = smov (!%p685_p11, %s3101_s29), 15  ;;  %s3548_s20 = smul.u32 1536, %s4247_s0 }
  0x85   : > { %v3704_v45 = vld [vmem:[#allocation10 + $0xb0] ss:$12 sps:$4 sm:$0xff]   ;;  %s3104_s30 = sshll.u32 %s4748_s29, 2  ;;  %s3102_s18 = sshll.u32 %s4748_s29, 3  ;;  %v3701_v61 = vld [vmem:[#allocation10 + $0xa8] ss:$12 sps:$4 sm:$0xff]  }
  0x86   : > { %3405 = vmatpush3.bf16.msra.mxu1 %v3663_v5  ;;  %s4417_s25 = scalar_lea.vmem %s4734_s23, %s3104_s30  ;;  %s4422_s5 = scalar_lea.vmem %s4681_s3, %s3104_s30  ;;  %v3110_v55 = vld [vmem:[#allocation7] ss:$0 sm:$0xff]  ;;  %v3707_v1 = vld [vmem:[#allocation10 + $0x94] ss:$12 sps:$4 sm:$0xff]   ;;  %v3708_v2 = vld [vmem:[#allocation10 + $0x98] ss:$12 sps:$4 sm:$0xff]  }
  0x87   : > { %3406 = vmatprep.subr.bf16.mxu1 %v4125_v0  ;;  %1084 = vmatpush1.bf16.msra.mxu0 %v3679_v16  ;;  %s688_s19 = scalar_lea.vmem %s4735_s21, %s3102_s18  ;;  %v3733_v3 = vld [vmem:[%s4417_s25] sm:$0xff]   ;;  %v3717_v13 = vld [vmem:[#allocation10 + $0x48] ss:$12 sps:$4 sm:$0xff]   ;;  %s681_s29 = sand.u32 1, %s4105_s28  }
  0x88   : > { %1085 = vmatprep.subr.bf16.mxu0 %v3681_v17  ;;  %v1162_v47 = vld [vmem:[%s688_s19 + $0x10] sm:$0xff]  ;;  %v1160_v48 = vld [vmem:[%s688_s19] sm:$0xff]  ;;  %v1163_v49 = vld [vmem:[%s688_s19 + $0x18] sm:$0xff]  ;;  %s3547_s30 = smul.u32 96, %s681_s29  ;;  %s4736_s26 = sld [smem:[#allocation29_spill]] }
  0x89   : > { %vm1178_vm3 = vcmp.eq.s32.totalorder %v1162_v47, 1  ;;  %vm1176_vm4 = vcmp.eq.s32.totalorder %v1160_v48, 1  ;;  %vm1179_vm5 = vcmp.eq.s32.totalorder %v1163_v49, 1  ;;  %v1161_v50 = vld [vmem:[%s688_s19 + $0x8] sm:$0xff]  ;;  %v3705_v4 = vld [vmem:[#allocation10 + $0x90] ss:$12 sps:$4 sm:$0xff]  }
  0x8a   : > { %3407 = vmatpush3.bf16.msra.mxu1 %v3664_v6  ;;  %v1182_v51 = vsel %vm1178_vm3, 1, %v4127_v46  ;;  %v1180_v52 = vsel %vm1176_vm4, 1, %v4127_v46  ;;  %vm1177_vm6 = vcmp.eq.s32.totalorder %v1161_v50, 1  ;;  %v1183_v53 = vsel %vm1179_vm5, 1, %v4127_v46  ;;  %v3711_v5 = vld [vmem:[#allocation10 + $0x7c] ss:$12 sps:$4 sm:$0xff]  }
  0x8b   : > { %3408 = vmatprep.subr.bf16.mxu1 %v4125_v0  ;;  %1086 = vmatpush1.bf16.msra.mxu0 %v3683_v18  ;;  %v1181_v54 = vsel %vm1177_vm6, 1, %v4127_v46  ;;  %v3712_v6 = vld [vmem:[#allocation10 + $0x80] ss:$12 sps:$4 sm:$0xff]   ;;  %v3720_v12 = vld [vmem:[#allocation10 + $0x50] ss:$12 sps:$4 sm:$0xff]   ;;  %v1164_v50 = vlaneseq  ;;  %s4610_s27 = scalar_lea.vmem [#allocation13], %s3547_s30 }
  0x8c   : > { %1087 = vmatprep.subr.bf16.mxu0 %v3685_v19  ;;  %1191 = vperm.xlu1 %3659, %v1182_v51   ;;  %v3719_v11 = vld [vmem:[#allocation10 + $0x4c] ss:$12 sps:$4 sm:$0xff]   ;;  %v3723_v14 = vld [vmem:[#allocation10 + $0x34] ss:$12 sps:$4 sm:$0xff]   ;;  %v3721_v16 = vld [vmem:[#allocation10 + $0x30] ss:$12 sps:$4 sm:$0xff]  }
  0x8d   : > { %1185 = vperm.xlu0 %3658, %v1180_v52   ;;  %v3724_v15 = vld [vmem:[#allocation10 + $0x38] ss:$12 sps:$4 sm:$0xff]   ;;  %v3727_v17 = vld [vmem:[#allocation10 + $0x1c] ss:$12 sps:$4 sm:$0xff]   ;;  %v3728_v18 = vld [vmem:[#allocation10 + $0x20] ss:$12 sps:$4 sm:$0xff]  }
  0x8e   : > { %3409 = vmatpush3.bf16.msra.mxu1 %v3665_v7  ;;  %v3709_v7 = vld [vmem:[#allocation10 + $0x78] ss:$12 sps:$4 sm:$0xff]   ;;  %v4464_v51 = vshrl.u32 %v1164_v50, 7  ;;  %s2939_s23 = sshll.u32 %s4610_s27, 4  ;;  %s4638_s0 = scalar_lea.sflag [#allocation4], %s681_s29  ;;  %s4628_s23 = int_to_ptr.vmem [resolvable:$true] %s2939_s23 }
  0x8f   : > { %3410 = vmatprep.subr.bf16.mxu1 %v4125_v0  ;;  %1088 = vmatpush1.bf16.msra.mxu0 %v3687_v20  ;;  %v3725_v19 = vld [vmem:[#allocation10 + $0x18] ss:$12 sps:$4 sm:$0xff]   ;;  %s4037_s18 = scalar_lea.vmem %s4628_s23, 1536  ;;  %p4737_p5 = scmp.ne.s32.totalorder %s4717_s2, 0 }
  0x90   : > { %1089 = vmatprep.subr.bf16.mxu0 %v3689_v21  ;;  %1194 = vperm.xlu1 %3659, %v1183_v53   ;;  %v3731_v20 = vld [vmem:[#allocation10 + $0x4] ss:$12 sps:$4 sm:$0xff]   ;;  %v3732_v21 = vld [vmem:[#allocation10 + $0x8] ss:$12 sps:$4 sm:$0xff]   ;;  %p4038_p6 = scmp.ne.s32.totalorder %s4628_s23, %s4037_s18  ;;  %s4128_s1 = smov [#allocation13]  }
  0x91   : > { %1188 = vperm.xlu0 %3658, %v1181_v54   ;;  %v4467_v54 = vsub.s32 0, %v4464_v51  ;;  %s4041_s24 = sshll.u32 %s4128_s1, 4  ;;  %s4042_s24 = int_to_ptr.vmem [resolvable:$false] %s4041_s24 }
  0x92   : > { %3411 = vmatpush3.bf16.msra.mxu1 %v3666_v8  ;;  %v3715_v8 = vld [vmem:[#allocation10 + $0x64] ss:$12 sps:$4 sm:$0xff]   ;;  %p4039_p10 = pnand %p4038_p6, %p4737_p5  ;;  %s4043_s21 = scalar_lea.vmem %s4042_s24, 3072 }
  0x93   : > { %3412 = vmatprep.subr.bf16.mxu1 %v4125_v0  ;;  %1090 = vmatpush1.bf16.msra.mxu0 %v3691_v22  ;;  %v3729_v22 = vld [vmem:[#allocation10] ss:$12 sps:$4 sm:$0xff]   ;;  %p4044_p0 = scmp.lt.s32.totalorder %s4628_s23, %s4042_s24  ;;  %p4045_p1 = scmp.lt.s32.totalorder %s4043_s21, %s4037_s18 }
  0x94   : > { %1091 = vmatprep.subr.bf16.mxu0 %v3693_v23  ;;  %v1470_v23 = vld [vmem:[%s4686_s8] sm:$0x3]  ;;  %p4040_p9 = pneg %p4039_p10 }
  0x95   : > { %p4046_p13 = por %p4045_p1, %p4044_p0 }
  0x96   : > { %3413 = vmatpush3.bf16.msra.mxu1 %v3667_v9  ;;  %v3716_v9 = vld [vmem:[#allocation10 + $0x68] ss:$12 sps:$4 sm:$0xff]  }
  0x97   : > { %3414 = vmatprep.subr.bf16.mxu1 %v4125_v0  ;;  %1092 = vmatpush1.bf16.msra.mxu0 %v3695_v39  ;;  %v3748_v39 = vld [vmem:[#allocation8 + $0x20] sm:$0xff]   ;;  %p4047_p3 = pnand %p4046_p13, %p4040_p9 }
  0x98   : > { %1093 = vmatprep.subr.bf16.mxu0 %v3697_v41 }
  0x9a   : > { %3415 = vmatpush3.bf16.msra.mxu1 %v3668_v10  ;;  %v3713_v10 = vld [vmem:[#allocation10 + $0x60] ss:$12 sps:$4 sm:$0xff]  }
  0x9b   : > { %3420 = vmatprep.subr.bf16.mxu1 %v4125_v0  ;;  %1094 = vmatpush1.bf16.msra.mxu0 %v3699_v42 }
  0x9c   : > { %1364 = vmatprep.subr.bf16.mxu0 %v3703_v44 }
 0x107   : > { %v1192_v52 = vpop.permute.xlu1 %1191 }
 0x108   : > { %v1186_v53 = vpop.permute.xlu0 %1185  ;;  %vm1198_vm10 = vcmp.eq.s32.totalorder %v1192_v52, 1 }
 0x109   : > { %vm1196_vm11 = vcmp.eq.s32.totalorder %v1186_v53, 1 }
 0x13d   : > { %v758_v25 = vpop.f32.mrf.mxu1 }
 0x13e   : > { %v759_v26 = vadd.f32 %v3107_v24, %v758_v25  ;;  %v3735_v24 = vld [vmem:[%s4417_s25 + $0x8] sm:$0xff]   ;;  %v1497_v25 = vsel %vm1495_vm8, %v1470_v23, 0 }
 0x13f   : > { %v3398_v27 = vpop.f32.mrf.mxu1 }
 0x140   : > { %vm764_vm2 = vcmp.ge.f32.partialorder %v759_v26, 0.0  ;;  %v765_v28 = vmul.f32 0.2, %v759_v26  ;;  %v3734_v27 = vld [vmem:[%s4422_s5 + $0x8] sm:$0xff]  }
 0x141   : > { %v761_v29 = vpop.f32.mrf.mxu1 }
 0x142   : > { %v766_v30 = vsel %vm764_vm2, %v759_v26, %v765_v28  ;;  %v3736_v26 = vld [vmem:[%s4422_s5] sm:$0xff]   ;;  %v3737_v28 = vld [vmem:[%s4688_s10 + $0x38] sm:$0xff]   ;;  %v3738_v29 = vld [vmem:[%s4688_s10 + $0x30] sm:$0xff]   ;;  %s4633_s5 = scalar_lea.hbm %s4736_s26, %s3548_s20 }
 0x143   : > { %v767_v32 = vpack.c.bf16 %v766_v30, %v766_v30  ;;  %v3399_v33 = vpop.f32.mrf.mxu1  ;;  %v3739_v30 = vld [vmem:[%s4688_s10 + $0x28] sm:$0xff]  }
 0x144   : > { %v3742_v33 = vld [vmem:[%s4688_s10 + $0x10] sm:$0xff]  }
 0x145   : > { %3417 = vmatmul.mubr.bf16.vlgmr.msra.gmra.mxu1 %v767_v32  ;;  %v3741_v32 = vld [vmem:[%s4688_s10 + $0x18] sm:$0xff]  }
 0x146   : > { %3421 = vmatpush3.bf16.msra.mxu1 %v3672_v31  ;;  %3436 = vmatprep.mubr.msk.bf16.mxu1 %vm4126_vm0, %v4125_v0  ;;  %v3740_v31 = vld [vmem:[%s4688_s10 + $0x20] sm:$0xff]  }
 0x147   : > { %3422 = vmatprep.subr.bf16.mxu1 %v4125_v0 }
 0x14a   : > { %3423 = vmatpush3.bf16.msra.mxu1 %v3676_v34  ;;  %v3743_v34 = vld [vmem:[%s4688_s10 + $0x8] sm:$0xff]  }
 0x14b   : > { %3424 = vmatprep.subr.bf16.mxu1 %v4125_v0 }
 0x14e   : > { %3425 = vmatpush3.bf16.msra.mxu1 %v3680_v35  ;;  %v3744_v35 = vld [vmem:[%s4688_s10] sm:$0xff]  }
 0x14f   : > { %3426 = vmatprep.subr.bf16.mxu1 %v4125_v0 }
 0x152   : > { %3427 = vmatpush3.bf16.msra.mxu1 %v3684_v36  ;;  %v3745_v36 = vld [vmem:[#allocation8 + $0x38] sm:$0xff]  }
 0x153   : > { %3428 = vmatprep.subr.bf16.mxu1 %v4125_v0 }
 0x156   : > { %3429 = vmatpush3.bf16.msra.mxu1 %v3688_v37  ;;  %v3746_v37 = vld [vmem:[#allocation8 + $0x30] sm:$0xff]  }
 0x157   : > { %3430 = vmatprep.subr.bf16.mxu1 %v4125_v0 }
 0x15a   : > { %3431 = vmatpush3.bf16.msra.mxu1 %v3692_v38  ;;  %v3747_v38 = vld [vmem:[#allocation8 + $0x28] sm:$0xff]  }
 0x15b   : > { %3432 = vmatprep.subr.bf16.mxu1 %v4125_v0 }
 0x15e   : > { %3433 = vmatpush3.bf16.msra.mxu1 %v3696_v40  ;;  %v3749_v40 = vld [vmem:[#allocation8 + $0x18] sm:$0xff]  }
 0x15f   : > { %3434 = vmatprep.subr.bf16.mxu1 %v4125_v0 }
 0x162   : > { %3435 = vmatpush3.bf16.msra.mxu1 %v3700_v43 }
 0x163   : > { %3440 = vmatprep.subr.bf16.mxu1 %v3704_v45 }
 0x205   : > { %v873_v56 = vpop.f32.mrf.mxu1 }
 0x206   : > { %v874_v57 = vadd.f32 %v3110_v55, %v873_v56  ;;  %v4470_v55 = vsub.s32 1, %v4464_v51 }
 0x207   : > { %v3418_v58 = vpop.f32.mrf.mxu1 }
 0x208   : > { %vm879_vm7 = vcmp.ge.f32.partialorder %v874_v57, 0.0  ;;  %v880_v59 = vmul.f32 0.2, %v874_v57 }
 0x209   : > { %v876_v60 = vpop.f32.mrf.mxu1 }
 0x20a   : > { %v881_v62 = vsel %vm879_vm7, %v874_v57, %v880_v59  ;;  %v1195_v60 = vpop.permute.xlu1 %1194 }
 0x20b   : > { %v3419_v63 = vpop.f32.mrf.mxu1  ;;  %v882_v0 = vpack.c.bf16 %v881_v62, %v881_v62  ;;  %vm1199_vm12 = vcmp.eq.s32.totalorder %v1195_v60, 1  ;;  %v3752_v60 = vld [vmem:[#allocation8] sm:$0xff]  }
 0x20d   : > { %1112 = vmatmul.mubr.bf16.vlgmr.msra.gmra.mxu0 %v882_v0  ;;  %3437 = vmatmul.mubr.bf16.vlgmr.msra.gmra.mxu1 %v882_v0 }
 0x20e   : > { %1365 = vmatpush1.bf16.msra.mxu0 %v3701_v61  ;;  %3441 = vmatpush3.bf16.msra.mxu1 %v3704_v45  ;;  %v4480_v61 = vpop.permute.xlu0 %1188 }
 0x20f   : > { %1366 = vmatprep.subr.bf16.mxu0 %v3707_v1  ;;  %3442 = vmatprep.subr.bf16.mxu1 %v3708_v2  ;;  %vm1197_vm13 = vcmp.eq.s32.totalorder %v4480_v61, 1 }
 0x210   : > { %1396 = vmatprep.mubr.bf16.mxu0 %v4127_v46  ;;  %3456 = vmatprep.mubr.bf16.mxu1 %v3733_v3 }
 0x212   : > { %1367 = vmatpush1.bf16.msra.mxu0 %v3705_v4  ;;  %3443 = vmatpush3.bf16.msra.mxu1 %v3708_v2 }
 0x213   : > { %1368 = vmatprep.subr.bf16.mxu0 %v3711_v5  ;;  %3444 = vmatprep.subr.bf16.mxu1 %v3712_v6 }
 0x216   : > { %1369 = vmatpush1.bf16.msra.mxu0 %v3709_v7  ;;  %3445 = vmatpush3.bf16.msra.mxu1 %v3712_v6 }
 0x217   : > { %1370 = vmatprep.subr.bf16.mxu0 %v3715_v8  ;;  %3446 = vmatprep.subr.bf16.mxu1 %v3716_v9 }
 0x21a   : > { %1371 = vmatpush1.bf16.msra.mxu0 %v3713_v10  ;;  %3447 = vmatpush3.bf16.msra.mxu1 %v3716_v9 }
 0x21b   : > { %1372 = vmatprep.subr.bf16.mxu0 %v3719_v11  ;;  %3448 = vmatprep.subr.bf16.mxu1 %v3720_v12 }
 0x21e   : > { %1373 = vmatpush1.bf16.msra.mxu0 %v3717_v13  ;;  %3449 = vmatpush3.bf16.msra.mxu1 %v3720_v12 }
 0x21f   : > { %1374 = vmatprep.subr.bf16.mxu0 %v3723_v14  ;;  %3450 = vmatprep.subr.bf16.mxu1 %v3724_v15 }
 0x222   : > { %1375 = vmatpush1.bf16.msra.mxu0 %v3721_v16  ;;  %3451 = vmatpush3.bf16.msra.mxu1 %v3724_v15 }
 0x223   : > { %1376 = vmatprep.subr.bf16.mxu0 %v3727_v17  ;;  %3452 = vmatprep.subr.bf16.mxu1 %v3728_v18 }
 0x226   : > { %1377 = vmatpush1.bf16.msra.mxu0 %v3725_v19  ;;  %3453 = vmatpush3.bf16.msra.mxu1 %v3728_v18 }
 0x227   : > { %1378 = vmatprep.subr.bf16.mxu0 %v3731_v20  ;;  %3454 = vmatprep.subr.bf16.mxu1 %v3732_v21 }
 0x22a   : > { %1379 = vmatpush1.bf16.msra.mxu0 %v3729_v22  ;;  %3455 = vmatpush3.bf16.msra.mxu1 %v3732_v21 }
 0x22b   : > { %3546 = vmatprep.subr.msk.bf16.mxu0 %vm1495_vm8, %v1470_v23  ;;  %3486 = vmatprep.subr.bf16.mxu1 %v3745_v36 }
 0x22d   : > { %1397 = vmatmul.mubr.bf16.vlgmr.msra.gmra.mxu0 %v3733_v3  ;;  %3457 = vmatmul.mubr.bf16.vlgmr.msra.gmra.mxu1 %v3735_v24 }
 0x22e   : > { %3461 = vmatpush3.bf16.msra.mxu0 %v1497_v25  ;;  %1406 = vmatprep.mubr.bf16.mxu0 %v4127_v46 }
 0x22f   : > { %3466 = vmatprep.subr.bf16.mxu0 %v3737_v28  ;;  %3487 = vmatpush3.bf16.msra.mxu1 %v3745_v36 }
 0x230   : > { %3488 = vmatprep.subr.bf16.mxu1 %v3746_v37 }
 0x233   : > { %3489 = vmatpush3.bf16.msra.mxu1 %v3746_v37 }
 0x234   : > { %3490 = vmatprep.subr.bf16.mxu1 %v3747_v38 }
 0x235   : > { %1407 = vmatmul.mubr.bf16.gmra.mxu0 %v3735_v24 }
 0x236   : > { %3462 = vmatprep.mubr.msk.bf16.mxu0 %vm1488_vm9, %v3736_v26 }
 0x237   : > { %3491 = vmatpush3.bf16.msra.mxu1 %v3747_v38 }
 0x238   : > { %3492 = vmatprep.subr.bf16.mxu1 %v3748_v39 }
 0x23b   : > { %3493 = vmatpush3.bf16.msra.mxu1 %v3748_v39 }
 0x23c   : > { %3494 = vmatprep.subr.bf16.mxu1 %v3749_v40 }
 0x23d   : > { %3463 = vmatmul.mubr.msk.bf16.vlgmr.msra.gmra.mxu0 %vm1488_vm9, %v3734_v27 }
 0x23e   : > { %3467 = vmatpush3.bf16.msra.mxu0 %v3737_v28 }
 0x23f   : > { %3468 = vmatprep.subr.bf16.mxu0 %v3738_v29  ;;  %3495 = vmatpush3.bf16.msra.mxu1 %v3749_v40 }
 0x242   : > { %3469 = vmatpush3.bf16.msra.mxu0 %v3738_v29 }
 0x243   : > { %3470 = vmatprep.subr.bf16.mxu0 %v3739_v30 }
 0x246   : > { %3471 = vmatpush3.bf16.msra.mxu0 %v3739_v30 }
 0x247   : > { %3472 = vmatprep.subr.bf16.mxu0 %v3740_v31 }
 0x24a   : > { %3473 = vmatpush3.bf16.msra.mxu0 %v3740_v31 }
 0x24b   : > { %3474 = vmatprep.subr.bf16.mxu0 %v3741_v32 }
 0x24e   : > { %3475 = vmatpush3.bf16.msra.mxu0 %v3741_v32 }
 0x24f   : > { %3476 = vmatprep.subr.bf16.mxu0 %v3742_v33 }
 0x252   : > { %3477 = vmatpush3.bf16.msra.mxu0 %v3742_v33 }
 0x253   : > { %3478 = vmatprep.subr.bf16.mxu0 %v3743_v34 }
 0x256   : > { %3479 = vmatpush3.bf16.msra.mxu0 %v3743_v34  ;;  %v3169_v34 = vld [vmem:[%s4687_s9] ss:$0 sm:$0xff] }
 0x257   : > { %3480 = vmatprep.subr.bf16.mxu0 %v3744_v35 }
 0x25a   : > { %3481 = vmatpush3.bf16.msra.mxu0 %v3744_v35 }
 0x2cd   : > { %v1113_v41 = vpop.f32.mrf.mxu0  ;;  %v1154_v42 = vpop.f32.mrf.mxu1 }
 0x2ce   : > { %v1167_v56 = vrot.slane %v1113_v41, %v4467_v54  ;;  %v1203_v57 = vrot.slane %v1113_v41, %v4470_v55  ;;  %v4475_v58 = vrot.slane %v1154_v42, %v4467_v54  ;;  %v4478_v59 = vrot.slane %v1154_v42, %v4470_v55 }
 0x2cf   : > { %v1115_v43 = vpop.f32.mrf.mxu0  ;;  %v3438_v44 = vpop.f32.mrf.mxu1 }
 0x2d0   : > { %v1171_v62 = vrot.slane %v1115_v43, %v4467_v54  ;;  %v1207_v63 = vrot.slane %v1115_v43, %v4470_v55  ;;  %v1212_v0 = vsel %vm1196_vm11, %v1203_v57, %v1167_v56  ;;  %v1220_v2 = vsel %vm1198_vm10, %v4478_v59, %v4475_v58 }
 0x2d1   : > { %v1117_v45 = vpop.f32.mrf.mxu0  ;;  %v1157_v47 = vpop.f32.mrf.mxu1  ;;  %v1214_v8 = vsel %vm1196_vm11, %v4478_v59, %v4475_v58  ;;  %v1215_v12 = vsel %vm1197_vm13, %v1203_v57, %v1167_v56  ;;  %v1223_v14 = vsel %vm1199_vm12, %v4478_v59, %v4475_v58  ;;  %v1218_v21 = vsel %vm1198_vm10, %v1203_v57, %v1167_v56 }
 0x2d2   : > { %v1213_v6 = vsel %vm1196_vm11, %v1207_v63, %v1171_v62  ;;  %v1216_v18 = vsel %vm1197_vm13, %v1207_v63, %v1171_v62  ;;  %v1219_v24 = vsel %vm1198_vm10, %v1207_v63, %v1171_v62  ;;  %v1221_v27 = vsel %vm1199_vm12, %v1203_v57, %v1167_v56  ;;  %v3750_v56 = vld [vmem:[#allocation8 + $0x10] sm:$0xff]   ;;  %v3751_v57 = vld [vmem:[#allocation8 + $0x8] sm:$0xff]  }
 0x2d3   : > { %v1118_v48 = vpop.f32.mrf.mxu0  ;;  %v3439_v49 = vpop.f32.mrf.mxu1  ;;  %v1222_v30 = vsel %vm1199_vm12, %v1207_v63, %v1171_v62  ;;  %3496 = vmatprep.subr.bf16.mxu1 %v3750_v56  ;;  %v3753_v62 = vld [vmem:[#allocation10 + $0x228] ss:$12 sps:$4 sm:$0xff]   ;;  %v3755_v63 = vld [vmem:[#allocation10 + $0x22c] ss:$12 sps:$4 sm:$0xff]  }
 0x2d4   : > { %3497 = vmatpush3.bf16.msra.mxu1 %v3750_v56  ;;  %1990 = vmatprep.subr.bf16.mxu0 %v3755_v63  ;;  %v3787_v56 = vld [vmem:[#allocation11 + $0xac] ss:$12 sps:$4 sm:$0xff]  }
 0x2d5   : > { %3498 = vmatprep.subr.bf16.mxu1 %v3751_v57  ;;  %v3183_v63 = vld [vmem:[%s4691_s13] ss:$0 sm:$0xff] }
 0x2d8   : > { %3499 = vmatpush3.bf16.msra.mxu1 %v3751_v57  ;;  %v3814_v57 = vld [vmem:[#allocation11 + $0x22c] ss:$12 sps:$4 sm:$0xff]  }
 0x2d9   : > { %3500 = vmatprep.subr.bf16.mxu1 %v3752_v60 }
 0x2dc   : > { %3501 = vmatpush3.bf16.msra.mxu1 %v3752_v60 }
 0x2ed   : > { %v1398_v1 = vpop.f32.mrf.mxu0  ;;  %v3458_v3 = vpop.f32.mrf.mxu1 }
 0x2ee   : > { %v4488_v4 = vadd.f32 %v1398_v1, %v1212_v0  ;;  %v4490_v5 = vadd.f32 %v3458_v3, %v1220_v2  ;;  %v3756_v0 = vld [vmem:[#allocation10 + $0x230] ss:$12 sps:$4 sm:$0xff]   ;;  %v3759_v1 = vld [vmem:[#allocation10 + $0x214] ss:$12 sps:$4 sm:$0xff]  }
 0x2ef   : > { %v1400_v7 = vpop.f32.mrf.mxu0  ;;  %v1451_v9 = vpop.f32.mrf.mxu1  ;;  %3506 = vmatprep.subr.bf16.mxu1 %v3756_v0  ;;  %v3757_v2 = vld [vmem:[#allocation10 + $0x210] ss:$12 sps:$4 sm:$0xff]  }
 0x2f0   : > { %v4494_v10 = vadd.f32 %v1400_v7, %v1213_v6  ;;  %v4496_v11 = vadd.f32 %v1451_v9, %v1214_v8  ;;  %v3763_v3 = vld [vmem:[#allocation10 + $0x1fc] ss:$12 sps:$4 sm:$0xff]   ;;  %v3761_v6 = vld [vmem:[#allocation10 + $0x1f8] ss:$12 sps:$4 sm:$0xff]   ;;  %v3765_v8 = vld [vmem:[#allocation10 + $0x1e0] ss:$12 sps:$4 sm:$0xff]  }
 0x2f1   : > { %v1402_v13 = vpop.f32.mrf.mxu0  ;;  %v3459_v15 = vpop.f32.mrf.mxu1  ;;  %v3767_v7 = vld [vmem:[#allocation10 + $0x1e4] ss:$12 sps:$4 sm:$0xff]   ;;  %v3771_v9 = vld [vmem:[#allocation10 + $0x1cc] ss:$12 sps:$4 sm:$0xff]  }
 0x2f2   : > { %v4503_v16 = vadd.f32 %v1402_v13, %v1215_v12  ;;  %v4505_v17 = vadd.f32 %v3459_v15, %v1223_v14  ;;  %v3769_v12 = vld [vmem:[#allocation10 + $0x1c8] ss:$12 sps:$4 sm:$0xff]   ;;  %v3174_v14 = vld [vmem:[%s4689_s11] ss:$0 sm:$0xff] }
 0x2f3   : > { %v1404_v19 = vpop.f32.mrf.mxu0  ;;  %v4530_v60 = vpop.f32.mrf.mxu1 }
 0x2f4   : > { %v4509_v20 = vadd.f32 %v1404_v19, %v1216_v18 }
 0x2f5   : > { %v1408_v22 = vpop.f32.mrf.mxu0 }
 0x2f6   : > { %v4512_v23 = vadd.f32 %v1408_v22, %v1218_v21 }
 0x2f7   : > { %v1410_v25 = vpop.f32.mrf.mxu0 }
 0x2f8   : > { %v4515_v26 = vadd.f32 %v1410_v25, %v1219_v24 }
 0x2f9   : > { %v1412_v28 = vpop.f32.mrf.mxu0 }
 0x2fa   : > { %v4518_v29 = vadd.f32 %v1412_v28, %v1221_v27 }
 0x2fb   : > { %v1414_v31 = vpop.f32.mrf.mxu0 }
 0x2fc   : > { %v4521_v32 = vadd.f32 %v1414_v31, %v1222_v30 }
 0x2fd   : > { %v3464_v33 = vpop.f32.mrf.mxu0 }
 0x2fe   : > { %v1542_v37 = vadd.f32 %v3464_v33, %v3169_v34 }
 0x2ff   : > { %v1533_v35 = vpop.f32.mrf.mxu0 }
 0x300   : > { %v1534_v36 = vadd.f32 %v3169_v34, %v1533_v35  ;;  %v1554_v44 = vmul.f32 0.2, %v1542_v37  ;;  %vm1550_vm0 = vcmp.ge.f32.partialorder %v1542_v37, 0.0 }
 0x301   : > { %v3465_v38 = vpop.f32.mrf.mxu0 }
 0x302   : > { %v1545_v39 = vadd.f32 %v3465_v38, %v3169_v34  ;;  %v1552_v41 = vmul.f32 0.2, %v1534_v36  ;;  %vm1548_vm15 = vcmp.ge.f32.partialorder %v1534_v36, 0.0  ;;  %v1558_v50 = vsel %vm1550_vm0, %v1542_v37, %v1554_v44  ;;  %v3773_v44 = vld [vmem:[#allocation10 + $0x1b0] ss:$12 sps:$4 sm:$0xff]  }
 0x303   : > { %v1536_v40 = vpop.f32.mrf.mxu0 }
 0x304   : > { %vm1551_vm14 = vcmp.ge.f32.partialorder %v1545_v39, 0.0  ;;  %v1555_v42 = vmul.f32 0.2, %v1545_v39  ;;  %v1537_v43 = vadd.f32 %v3169_v34, %v1536_v40  ;;  %v1556_v48 = vsel %vm1548_vm15, %v1534_v36, %v1552_v41  ;;  %v3764_v40 = vld [vmem:[#allocation10 + $0x200] ss:$12 sps:$4 sm:$0xff]  }
 0x305   : > { %v3768_v41 = vld [vmem:[#allocation10 + $0x1e8] ss:$12 sps:$4 sm:$0xff]  }
 0x306   : > { %vm1549_vm1 = vcmp.ge.f32.partialorder %v1537_v43, 0.0  ;;  %v1553_v45 = vmul.f32 0.2, %v1537_v43  ;;  %v1559_v47 = vsel %vm1551_vm14, %v1545_v39, %v1555_v42  ;;  %v3760_v39 = vld [vmem:[#allocation10 + $0x218] ss:$12 sps:$4 sm:$0xff]  }
 0x307   : > { %v1561_v53 = vpack.c.bf16 %v1559_v47, %v1558_v50  ;;  %v3772_v42 = vld [vmem:[#allocation10 + $0x1d0] ss:$12 sps:$4 sm:$0xff]  }
 0x308   : > { %v1557_v49 = vsel %vm1549_vm1, %v1537_v43, %v1553_v45  ;;  %v3775_v43 = vld [vmem:[#allocation10 + $0x1b4] ss:$12 sps:$4 sm:$0xff]   ;;  %v3776_v45 = vld [vmem:[#allocation10 + $0x1b8] ss:$12 sps:$4 sm:$0xff]   ;;  %v3779_v47 = vld [vmem:[#allocation10 + $0x19c] ss:$12 sps:$4 sm:$0xff]  }
 0x309   : > { %v1560_v52 = vpack.c.bf16 %v1557_v49, %v1556_v48  ;;  %v3777_v48 = vld [vmem:[#allocation10 + $0x198] ss:$12 sps:$4 sm:$0xff]   ;;  %v3780_v49 = vld [vmem:[#allocation10 + $0x1a0] ss:$12 sps:$4 sm:$0xff]  }
 0x30a   : > { %v3783_v50 = vld [vmem:[#allocation10 + $0x184] ss:$12 sps:$4 sm:$0xff]  }
 0x30b   : > { %3482 = vmatprep.mubr.bf16.mxu0 %v1560_v52  ;;  %v3781_v52 = vld [vmem:[#allocation10 + $0x180] ss:$12 sps:$4 sm:$0xff]  }
 0x30c   : > { %3483 = vmatmul.mubr.bf16.vlgmr.msra.gmra.mxu0 %v1561_v53  ;;  %v3784_v53 = vld [vmem:[#allocation10 + $0x188] ss:$12 sps:$4 sm:$0xff]  }
 0x30d   : > { %2022 = vmatprep.mubr.bf16.mxu0 %v4127_v46  ;;  %1991 = vmatpush1.bf16.msra.mxu0 %v3753_v62 }
 0x30e   : > { %1992 = vmatprep.subr.bf16.mxu0 %v3759_v1 }
 0x311   : > { %1993 = vmatpush1.bf16.msra.mxu0 %v3757_v2 }
 0x312   : > { %1994 = vmatprep.subr.bf16.mxu0 %v3763_v3 }
 0x315   : > { %1995 = vmatpush1.bf16.msra.mxu0 %v3761_v6 }
 0x316   : > { %1996 = vmatprep.subr.bf16.mxu0 %v3767_v7 }
 0x319   : > { %1997 = vmatpush1.bf16.msra.mxu0 %v3765_v8 }
 0x31a   : > { %1998 = vmatprep.subr.bf16.mxu0 %v3771_v9 }
 0x31d   : > { %1999 = vmatpush1.bf16.msra.mxu0 %v3769_v12 }
 0x31e   : > { %2000 = vmatprep.subr.bf16.mxu0 %v3775_v43  ;;  %v3797_v43 = vld [vmem:[#allocation11 + $0x48] ss:$12 sps:$4 sm:$0xff]  }
 0x321   : > { %2001 = vmatpush1.bf16.msra.mxu0 %v3773_v44  ;;  %v3802_v44 = vld [vmem:[#allocation11 + $0x34] ss:$12 sps:$4 sm:$0xff]  }
 0x322   : > { %2002 = vmatprep.subr.bf16.mxu0 %v3779_v47  ;;  %v3805_v47 = vld [vmem:[#allocation11 + $0x1c] ss:$12 sps:$4 sm:$0xff]  }
 0x325   : > { %2003 = vmatpush1.bf16.msra.mxu0 %v3777_v48  ;;  %v3803_v48 = vld [vmem:[#allocation11 + $0x18] ss:$12 sps:$4 sm:$0xff]  }
 0x326   : > { %2004 = vmatprep.subr.bf16.mxu0 %v3783_v50  ;;  %v3806_v50 = vld [vmem:[#allocation11] ss:$12 sps:$4 sm:$0xff]  }
 0x329   : > { %2005 = vmatpush1.bf16.msra.mxu0 %v3781_v52  ;;  %v3811_v52 = vld [vmem:[#allocation11 + $0x16c] ss:$12 sps:$4 sm:$0xff]  }
 0x32a   : > { %2672 = vmatprep.subr.bf16.mxu0 %v3787_v56  ;;  %v3817_v56 = vld [vmem:[#allocation11 + $0x154] ss:$12 sps:$4 sm:$0xff]  }
 0x3cc   : > { %v3484_v13 = vpop.f32.mrf.mxu0 }
 0x3cd   : > { %v1676_v19 = vadd.f32 %v3484_v13, %v3174_v14 }
 0x3ce   : > { %v1667_v15 = vpop.f32.mrf.mxu0 }
 0x3cf   : > { %v1668_v18 = vadd.f32 %v3174_v14, %v1667_v15  ;;  %v1688_v30 = vmul.f32 0.2, %v1676_v19  ;;  %vm1684_vm4 = vcmp.ge.f32.partialorder %v1676_v19, 0.0 }
 0x3d0   : > { %v3485_v21 = vpop.f32.mrf.mxu0 }
 0x3d1   : > { %v1679_v22 = vadd.f32 %v3485_v21, %v3174_v14  ;;  %v1686_v25 = vmul.f32 0.2, %v1668_v18  ;;  %vm1682_vm3 = vcmp.ge.f32.partialorder %v1668_v18, 0.0  ;;  %v1692_v36 = vsel %vm1684_vm4, %v1676_v19, %v1688_v30  ;;  %v3820_v30 = vld [vmem:[#allocation11 + $0x214] ss:$12 sps:$4 sm:$0xff]  }
 0x3d2   : > { %v1670_v24 = vpop.f32.mrf.mxu0 }
 0x3d3   : > { %vm1685_vm2 = vcmp.ge.f32.partialorder %v1679_v22, 0.0  ;;  %v1689_v27 = vmul.f32 0.2, %v1679_v22  ;;  %v1671_v28 = vadd.f32 %v3174_v14, %v1670_v24  ;;  %v1690_v34 = vsel %vm1682_vm3, %v1668_v18, %v1686_v25  ;;  %v3785_v24 = vld [vmem:[#allocation11 + $0xa8] ss:$12 sps:$4 sm:$0xff]  }
 0x3d4   : > { %v3812_v25 = vld [vmem:[#allocation11 + $0x228] ss:$12 sps:$4 sm:$0xff]  }
 0x3d5   : > { %vm1683_vm5 = vcmp.ge.f32.partialorder %v1671_v28, 0.0  ;;  %v1687_v31 = vmul.f32 0.2, %v1671_v28  ;;  %v1693_v33 = vsel %vm1685_vm2, %v1679_v22, %v1689_v27 }
 0x3d6   : > { %v1695_v38 = vpack.c.bf16 %v1693_v33, %v1692_v36  ;;  %v3818_v33 = vld [vmem:[#allocation11 + $0x210] ss:$12 sps:$4 sm:$0xff]   ;;  %v3791_v36 = vld [vmem:[#allocation11 + $0x78] ss:$12 sps:$4 sm:$0xff]  }
 0x3d7   : > { %v1691_v35 = vsel %vm1683_vm5, %v1671_v28, %v1687_v31  ;;  %v3790_v28 = vld [vmem:[#allocation11 + $0x94] ss:$12 sps:$4 sm:$0xff]   ;;  %v3788_v31 = vld [vmem:[#allocation11 + $0x90] ss:$12 sps:$4 sm:$0xff]  }
 0x3d8   : > { %v1694_v37 = vpack.c.bf16 %v1691_v35, %v1690_v34  ;;  %v3793_v34 = vld [vmem:[#allocation11 + $0x7c] ss:$12 sps:$4 sm:$0xff]  }
 0x3d9   : > { %v3826_v35 = vld [vmem:[#allocation11 + $0x1fc] ss:$12 sps:$4 sm:$0xff]  }
 0x3da   : > { %3502 = vmatprep.mubr.bf16.mxu1 %v1694_v37  ;;  %v3824_v37 = vld [vmem:[#allocation11 + $0x1f8] ss:$12 sps:$4 sm:$0xff]  }
 0x3db   : > { %3503 = vmatmul.mubr.bf16.vlgmr.msra.gmra.mxu1 %v1695_v38  ;;  %v3796_v38 = vld [vmem:[#allocation11 + $0x64] ss:$12 sps:$4 sm:$0xff]  }
 0x3dc   : > { %3507 = vmatpush3.bf16.msra.mxu1 %v3756_v0 }
 0x3dd   : > { %3508 = vmatprep.subr.bf16.mxu1 %v3760_v39 }
 0x3e0   : > { %3509 = vmatpush3.bf16.msra.mxu1 %v3760_v39  ;;  %v3832_v39 = vld [vmem:[#allocation11 + $0x1e4] ss:$12 sps:$4 sm:$0xff]  }
 0x3e1   : > { %3510 = vmatprep.subr.bf16.mxu1 %v3764_v40 }
 0x3e4   : > { %3511 = vmatpush3.bf16.msra.mxu1 %v3764_v40  ;;  %v3794_v40 = vld [vmem:[#allocation11 + $0x60] ss:$12 sps:$4 sm:$0xff]  }
 0x3e5   : > { %3512 = vmatprep.subr.bf16.mxu1 %v3768_v41 }
 0x3e8   : > { %3513 = vmatpush3.bf16.msra.mxu1 %v3768_v41  ;;  %v3830_v41 = vld [vmem:[#allocation11 + $0x1e0] ss:$12 sps:$4 sm:$0xff]  }
 0x3e9   : > { %3514 = vmatprep.subr.bf16.mxu1 %v3772_v42 }
 0x3ec   : > { %3515 = vmatpush3.bf16.msra.mxu1 %v3772_v42  ;;  %v3799_v42 = vld [vmem:[#allocation11 + $0x4c] ss:$12 sps:$4 sm:$0xff]  }
 0x3ed   : > { %3516 = vmatprep.subr.bf16.mxu1 %v3776_v45 }
 0x3f0   : > { %3517 = vmatpush3.bf16.msra.mxu1 %v3776_v45  ;;  %v3800_v45 = vld [vmem:[#allocation11 + $0x30] ss:$12 sps:$4 sm:$0xff]  }
 0x3f1   : > { %3518 = vmatprep.subr.bf16.mxu1 %v3780_v49 }
 0x3f4   : > { %3519 = vmatpush3.bf16.msra.mxu1 %v3780_v49  ;;  %v3808_v49 = vld [vmem:[#allocation11 + $0x4] ss:$12 sps:$4 sm:$0xff]  }
 0x3f5   : > { %3520 = vmatprep.subr.bf16.mxu1 %v3784_v53 }
 0x3f8   : > { %3521 = vmatpush3.bf16.msra.mxu1 %v3784_v53  ;;  %v3809_v53 = vld [vmem:[#allocation11 + $0x168] ss:$12 sps:$4 sm:$0xff]  }
 0x3f9   : > { %2725 = vmatprep.subr.bf16.mxu1 %v3814_v57  ;;  %v3815_v57 = vld [vmem:[#allocation11 + $0x150] ss:$12 sps:$4 sm:$0xff]  }
 0x49b   : > { %v3504_v62 = vpop.f32.mrf.mxu1 }
 0x49c   : > { %v1810_v2 = vadd.f32 %v3504_v62, %v3183_v63  ;;  %v3823_v62 = vld [vmem:[#allocation11 + $0x13c] ss:$12 sps:$4 sm:$0xff]  }
 0x49d   : > { %v1801_v0 = vpop.f32.mrf.mxu1 }
 0x49e   : > { %v1802_v1 = vadd.f32 %v3183_v63, %v1801_v0  ;;  %v1822_v13 = vmul.f32 0.2, %v1810_v2  ;;  %vm1818_vm8 = vcmp.ge.f32.partialorder %v1810_v2, 0.0  ;;  %v3829_v0 = vld [vmem:[#allocation11 + $0x124] ss:$12 sps:$4 sm:$0xff]  }
 0x49f   : > { %v3505_v3 = vpop.f32.mrf.mxu1 }
 0x4a0   : > { %v1813_v6 = vadd.f32 %v3505_v3, %v3183_v63  ;;  %v1820_v8 = vmul.f32 0.2, %v1802_v1  ;;  %vm1816_vm7 = vcmp.ge.f32.partialorder %v1802_v1, 0.0  ;;  %v1826_v21 = vsel %vm1818_vm8, %v1810_v2, %v1822_v13  ;;  %v3835_v2 = vld [vmem:[#allocation11 + $0x10c] ss:$12 sps:$4 sm:$0xff]  }
 0x4a1   : > { %v1804_v7 = vpop.f32.mrf.mxu1  ;;  %v3838_v3 = vld [vmem:[#allocation11 + $0x1cc] ss:$12 sps:$4 sm:$0xff]   ;;  %v3842_v13 = vld [vmem:[#allocation11 + $0x1b0] ss:$12 sps:$4 sm:$0xff]  }
 0x4a2   : > { %vm1819_vm6 = vcmp.ge.f32.partialorder %v1813_v6, 0.0  ;;  %v1823_v9 = vmul.f32 0.2, %v1813_v6  ;;  %v1805_v12 = vadd.f32 %v3183_v63, %v1804_v7  ;;  %v1824_v18 = vsel %vm1816_vm7, %v1802_v1, %v1820_v8  ;;  %v3821_v63 = vld [vmem:[#allocation11 + $0x138] ss:$12 sps:$4 sm:$0xff]  }
 0x4a3   : > { %v3827_v1 = vld [vmem:[#allocation11 + $0x120] ss:$12 sps:$4 sm:$0xff]   ;;  %v3836_v7 = vld [vmem:[#allocation11 + $0x1c8] ss:$12 sps:$4 sm:$0xff]  }
 0x4a4   : > { %vm1817_vm9 = vcmp.ge.f32.partialorder %v1805_v12, 0.0  ;;  %v1821_v14 = vmul.f32 0.2, %v1805_v12  ;;  %v1827_v15 = vsel %vm1819_vm6, %v1813_v6, %v1823_v9  ;;  %v3833_v6 = vld [vmem:[#allocation11 + $0x108] ss:$12 sps:$4 sm:$0xff]  }
 0x4a5   : > { %v1829_v27 = vpack.c.bf16 %v1827_v15, %v1826_v21  ;;  %v3841_v8 = vld [vmem:[#allocation11 + $0xf4] ss:$12 sps:$4 sm:$0xff]   ;;  %v3850_v15 = vld [vmem:[#allocation11 + $0x19c] ss:$12 sps:$4 sm:$0xff]   ;;  %v3853_v21 = vld [vmem:[#allocation11 + $0xc4] ss:$12 sps:$4 sm:$0xff]  }
 0x4a6   : > { %v1825_v19 = vsel %vm1817_vm9, %v1805_v12, %v1821_v14  ;;  %v3844_v9 = vld [vmem:[#allocation11 + $0x1b4] ss:$12 sps:$4 sm:$0xff]   ;;  %v3839_v12 = vld [vmem:[#allocation11 + $0xf0] ss:$12 sps:$4 sm:$0xff]  }
 0x4a7   : > { %v1828_v22 = vpack.c.bf16 %v1825_v19, %v1824_v18  ;;  %v3847_v14 = vld [vmem:[#allocation11 + $0xdc] ss:$12 sps:$4 sm:$0xff]   ;;  %v3845_v18 = vld [vmem:[#allocation11 + $0xd8] ss:$12 sps:$4 sm:$0xff]  }
 0x4a8   : > { %v3848_v19 = vld [vmem:[#allocation11 + $0x198] ss:$12 sps:$4 sm:$0xff]  }
 0x4a9   : > { %2023 = vmatmul.mubr.bf16.vlgmr.msra.gmra.mxu0 %v1828_v22  ;;  %3522 = vmatprep.mubr.bf16.mxu1 %v1828_v22  ;;  %v3856_v22 = vld [vmem:[#allocation11 + $0x184] ss:$12 sps:$4 sm:$0xff]  }
 0x4aa   : > { %3523 = vmatmul.mubr.bf16.vlgmr.msra.gmra.mxu1 %v1829_v27  ;;  %2032 = vmatprep.mubr.bf16.mxu0 %v4127_v46 }
 0x4ab   : > { %2673 = vmatpush1.bf16.msra.mxu0 %v3785_v24  ;;  %2726 = vmatpush1.bf16.msra.mxu1 %v3812_v25  ;;  %v3851_v24 = vld [vmem:[#allocation11 + $0xc0] ss:$12 sps:$4 sm:$0xff]  }
 0x4ac   : > { %2674 = vmatprep.subr.bf16.mxu0 %v3790_v28  ;;  %2727 = vmatprep.subr.bf16.mxu1 %v3820_v30  ;;  %v3854_v25 = vld [vmem:[#allocation11 + $0x180] ss:$12 sps:$4 sm:$0xff]   ;;  %v4537_v28 = vld [vmem:[#allocation11 + $0x230] ss:$12 sps:$4 sm:$0xff]  }
 0x4ad   : > { %2757 = vmatprep.mubr.bf16.mxu1 %v4127_v46  ;;  %v2104_v30 = vld [vmem:[%s4693_s15] sm:$0x7] }
 0x4af   : > { %2675 = vmatpush1.bf16.msra.mxu0 %v3788_v31  ;;  %2728 = vmatpush1.bf16.msra.mxu1 %v3818_v33  ;;  %v2116_v31 = vsub.s32 2, %v4464_v51  ;;  %v4545_v33 = vrot.slane %v2104_v30, %v4467_v54 }
 0x4b0   : > { %2676 = vmatprep.subr.bf16.mxu0 %v3793_v34  ;;  %2729 = vmatprep.subr.bf16.mxu1 %v3826_v35 }
 0x4b1   : > { %2033 = vmatmul.mubr.bf16.gmra.mxu0 %v1829_v27  ;;  %v3857_v27 = vld [vmem:[#allocation11 + $0x170] ss:$12 sps:$4 sm:$0xff]   ;;  %v2117_v35 = vrot.slane %v2104_v30, %v2116_v31 }
 0x4b3   : > { %2677 = vmatpush1.bf16.msra.mxu0 %v3791_v36  ;;  %2730 = vmatpush1.bf16.msra.mxu1 %v3824_v37 }
 0x4b4   : > { %2678 = vmatprep.subr.bf16.mxu0 %v3796_v38  ;;  %2731 = vmatprep.subr.bf16.mxu1 %v3832_v39 }
 0x4b7   : > { %2679 = vmatpush1.bf16.msra.mxu0 %v3794_v40  ;;  %2732 = vmatpush1.bf16.msra.mxu1 %v3830_v41  ;;  %v4552_v40 = vrot.slane %v2104_v30, %v4470_v55  ;;  %v3859_v30 = vld [vmem:[#allocation11 + $0xb0] ss:$12 sps:$4 sm:$0xff]  }
 0x4b8   : > { %2680 = vmatprep.subr.bf16.mxu0 %v3799_v42  ;;  %2733 = vmatprep.subr.bf16.mxu1 %v3838_v3 }
 0x4bb   : > { %2681 = vmatpush1.bf16.msra.mxu0 %v3797_v43  ;;  %2734 = vmatpush1.bf16.msra.mxu1 %v3836_v7 }
 0x4bc   : > { %2682 = vmatprep.subr.bf16.mxu0 %v3802_v44  ;;  %2735 = vmatprep.subr.bf16.mxu1 %v3844_v9 }
 0x4bf   : > { %2683 = vmatpush1.bf16.msra.mxu0 %v3800_v45  ;;  %2736 = vmatpush1.bf16.msra.mxu1 %v3842_v13 }
 0x4c0   : > { %2684 = vmatprep.subr.bf16.mxu0 %v3805_v47  ;;  %2737 = vmatprep.subr.bf16.mxu1 %v3850_v15 }
 0x4c3   : > { %2685 = vmatpush1.bf16.msra.mxu0 %v3803_v48  ;;  %2738 = vmatpush1.bf16.msra.mxu1 %v3848_v19 }
 0x4c4   : > { %2686 = vmatprep.subr.bf16.mxu0 %v3808_v49  ;;  %2739 = vmatprep.subr.bf16.mxu1 %v3856_v22 }
 0x4c7   : > { %2687 = vmatpush1.bf16.msra.mxu0 %v3806_v50  ;;  %2740 = vmatpush1.bf16.msra.mxu1 %v3854_v25 }
 0x4c8   : > { %2688 = vmatprep.subr.bf16.mxu0 %v3811_v52  ;;  %3356 = vmatprep.subr.bf16.mxu1 %v3857_v27 }
 0x4cb   : > { %2689 = vmatpush2.bf16.msra.mxu0 %v3809_v53 }
 0x4cc   : > { %2690 = vmatprep.subr.bf16.mxu0 %v3817_v56 }
 0x4cf   : > { %2691 = vmatpush2.bf16.msra.mxu0 %v3815_v57 }
 0x4d0   : > { %2692 = vmatprep.subr.bf16.mxu0 %v3823_v62 }
 0x4d3   : > { %2693 = vmatpush2.bf16.msra.mxu0 %v3821_v63 }
 0x4d4   : > { %2694 = vmatprep.subr.bf16.mxu0 %v3829_v0 }
 0x4d7   : > { %2695 = vmatpush2.bf16.msra.mxu0 %v3827_v1 }
 0x4d8   : > { %2696 = vmatprep.subr.bf16.mxu0 %v3835_v2 }
 0x4db   : > { %2697 = vmatpush2.bf16.msra.mxu0 %v3833_v6 }
 0x4dc   : > { %2698 = vmatprep.subr.bf16.mxu0 %v3841_v8 }
 0x4df   : > { %2699 = vmatpush2.bf16.msra.mxu0 %v3839_v12 }
 0x4e0   : > { %2700 = vmatprep.subr.bf16.mxu0 %v3847_v14 }
 0x4e3   : > { %2701 = vmatpush2.bf16.msra.mxu0 %v3845_v18 }
 0x4e4   : > { %2702 = vmatprep.subr.bf16.mxu0 %v3853_v21 }
 0x4e7   : > { %2703 = vmatpush2.bf16.msra.mxu0 %v3851_v24 }
 0x4e8   : > { %3526 = vmatprep.subr.bf16.mxu0 %v4537_v28 }
 0x569   : > { %v2024_v34 = vpop.f32.mrf.mxu0 }
 0x56a   : > { %v2092_v36 = vadd.f32 %v2024_v34, %v4488_v4  ;;  %v3524_v37 = vpop.f32.mrf.mxu1  ;;  %v3860_v34 = vld [vmem:[#allocation11 + $0x158] ss:$12 sps:$4 sm:$0xff]  }
 0x56b   : > { %v2100_v38 = vadd.f32 %v3524_v37, %v4490_v5  ;;  %v2026_v39 = vpop.f32.mrf.mxu0  ;;  %v1217_v5 = vsel %vm1197_vm13, %v4478_v59, %v4475_v58 }
 0x56c   : > { %v2121_v41 = vadd.f32 %v4545_v33, %v2092_v36  ;;  %v2093_v42 = vadd.f32 %v2026_v39, %v4494_v10  ;;  %v2077_v43 = vpop.f32.mrf.mxu1  ;;  %v1455_v56 = vadd.f32 %v4530_v60, %v1217_v5 }
 0x56d   : > { %v4556_v44 = vadd.f32 %v2117_v35, %v2100_v38  ;;  %v2094_v45 = vadd.f32 %v2077_v43, %v4496_v11  ;;  %v2028_v47 = vpop.f32.mrf.mxu0  ;;  %v3861_v38 = vld [vmem:[#allocation11 + $0x218] ss:$12 sps:$4 sm:$0xff]  }
 0x56e   : > { %vm2133_vm10 = vcmp.ge.f32.partialorder %v2121_v41, 0.0  ;;  %v2145_v48 = vmul.f32 0.2, %v2121_v41  ;;  %v2095_v4 = vadd.f32 %v2028_v47, %v4503_v16  ;;  %v3525_v49 = vpop.f32.mrf.mxu1  ;;  %v2122_v50 = vadd.f32 %v4552_v40, %v2093_v42 }
 0x56f   : > { %v2123_v52 = vadd.f32 %v2117_v35, %v2094_v45  ;;  %v2103_v10 = vadd.f32 %v3525_v49, %v4505_v17  ;;  %v2030_v53 = vpop.f32.mrf.mxu0  ;;  %vm2141_vm11 = vcmp.ge.f32.partialorder %v4556_v44, 0.0  ;;  %v2153_v62 = vmul.f32 0.2, %v4556_v44  ;;  %v3863_v45 = vld [vmem:[#allocation11 + $0x140] ss:$12 sps:$4 sm:$0xff]  }
 0x570   : > { %v2124_v11 = vadd.f32 %v4545_v33, %v2095_v4  ;;  %v2080_v57 = vpop.f32.mrf.mxu1  ;;  %v2157_v16 = vsel %vm2133_vm10, %v2121_v41, %v2145_v48  ;;  %v2096_v61 = vadd.f32 %v2030_v53, %v4509_v20  ;;  %vm2134_vm13 = vcmp.ge.f32.partialorder %v2122_v50, 0.0  ;;  %v3864_v49 = vld [vmem:[#allocation11 + $0x200] ss:$12 sps:$4 sm:$0xff]   ;;  %v3868_v53 = vld [vmem:[#allocation11 + $0x68] ss:$12 sps:$4 sm:$0xff]  }
 0x571   : > { %v2132_v63 = vadd.f32 %v2117_v35, %v2103_v10  ;;  %v2034_v58 = vpop.f32.mrf.mxu0  ;;  %v2097_v0 = vadd.f32 %v2080_v57, %v1455_v56  ;;  %v2146_v1 = vmul.f32 0.2, %v2122_v50  ;;  %vm2135_vm14 = vcmp.ge.f32.partialorder %v2123_v52, 0.0  ;;  %v3867_v10 = vld [vmem:[#allocation11 + $0x1e8] ss:$12 sps:$4 sm:$0xff]  }
 0x572   : > { %vm2136_vm12 = vcmp.ge.f32.partialorder %v2124_v11, 0.0  ;;  %v2148_v59 = vmul.f32 0.2, %v2124_v11  ;;  %v2098_v17 = vadd.f32 %v2034_v58, %v4512_v23  ;;  %v2125_v60 = vadd.f32 %v4552_v40, %v2096_v61  ;;  %v3870_v56 = vld [vmem:[#allocation11 + $0x1d0] ss:$12 sps:$4 sm:$0xff]  }
 0x573   : > { %v2036_v2 = vpop.f32.mrf.mxu0  ;;  %v2147_v3 = vmul.f32 0.2, %v2123_v52  ;;  %v2126_v7 = vadd.f32 %v2117_v35, %v2097_v0  ;;  %vm2144_vm0 = vcmp.ge.f32.partialorder %v2132_v63, 0.0  ;;  %v2156_v23 = vmul.f32 0.2, %v2132_v63 }
 0x574   : > { %v2160_v6 = vsel %vm2136_vm12, %v2124_v11, %v2148_v59  ;;  %v2099_v8 = vadd.f32 %v2036_v2, %v4515_v26  ;;  %vm2137_vm15 = vcmp.ge.f32.partialorder %v2125_v60, 0.0  ;;  %v2149_v20 = vmul.f32 0.2, %v2125_v60  ;;  %v3871_v11 = vld [vmem:[#allocation11 + $0x50] ss:$12 sps:$4 sm:$0xff]  }
 0x575   : > { %v4574_v9 = vpack.c.bf16 %v2160_v6, %v2157_v16  ;;  %v2127_v12 = vadd.f32 %v4545_v33, %v2098_v17  ;;  %v2038_v13 = vpop.f32.mrf.mxu0  ;;  %vm2138_vm1 = vcmp.ge.f32.partialorder %v2126_v7, 0.0  ;;  %v2150_v14 = vmul.f32 0.2, %v2126_v7  ;;  %v3872_v57 = vld [vmem:[#allocation11 + $0xf8] ss:$12 sps:$4 sm:$0xff]  }
 0x576   : > { %v2128_v15 = vadd.f32 %v4552_v40, %v2099_v8  ;;  %v2101_v18 = vadd.f32 %v2038_v13, %v4518_v29  ;;  %v2158_v21 = vsel %vm2134_vm13, %v2122_v50, %v2146_v1  ;;  %v2161_v22 = vsel %vm2137_vm15, %v2125_v60, %v2149_v20  ;;  %v3873_v16 = vld [vmem:[#allocation11 + $0x1b8] ss:$12 sps:$4 sm:$0xff]   ;;  %v3876_v61 = vld [vmem:[#allocation11 + $0x1a0] ss:$12 sps:$4 sm:$0xff]   ;;  %v3878_v59 = vld [vmem:[#allocation11 + $0xc8] ss:$12 sps:$4 sm:$0xff]  }
 0x577   : > { %v2040_v19 = vpop.f32.mrf.mxu0  ;;  %v2159_v26 = vsel %vm2135_vm14, %v2123_v52, %v2147_v3  ;;  %v2162_v24 = vsel %vm2138_vm1, %v2126_v7, %v2150_v14  ;;  %v2170_v27 = vpack.c.bf16 %v2161_v22, %v2158_v21  ;;  %vm2139_vm2 = vcmp.ge.f32.partialorder %v2127_v12, 0.0  ;;  %v3865_v52 = vld [vmem:[#allocation11 + $0x80] ss:$12 sps:$4 sm:$0xff]   ;;  %v3879_v0 = vld [vmem:[#allocation11 + $0x188] ss:$12 sps:$4 sm:$0xff]  }
 0x578   : > { %v2102_v25 = vadd.f32 %v2040_v19, %v4521_v32  ;;  %v2151_v35 = vmul.f32 0.2, %v2127_v12  ;;  %v2130_v36 = vadd.f32 %v4545_v33, %v2101_v18  ;;  %v2171_v37 = vpack.c.bf16 %v2162_v24, %v2159_v26  ;;  %v3877_v58 = vld [vmem:[#allocation11 + $0x20] ss:$12 sps:$4 sm:$0xff]   ;;  %v3880_v17 = vld [vmem:[#allocation11 + $0x8] ss:$12 sps:$4 sm:$0xff]  }
 0x579   : > { %v2152_v39 = vmul.f32 0.2, %v2128_v15  ;;  %2704 = vmatprep.mubr.bf16.mxu0 %v2170_v27  ;;  %v2165_v41 = vsel %vm2141_vm11, %v4556_v44, %v2153_v62  ;;  %v2168_v42 = vsel %vm2144_vm0, %v2132_v63, %v2156_v23  ;;  %vm2140_vm3 = vcmp.ge.f32.partialorder %v2128_v15, 0.0  ;;  %v3874_v62 = vld [vmem:[#allocation11 + $0x38] ss:$12 sps:$4 sm:$0xff]  }
 0x57a   : > { %v2131_v29 = vadd.f32 %v4552_v40, %v2102_v25  ;;  %vm2142_vm4 = vcmp.ge.f32.partialorder %v2130_v36, 0.0  ;;  %v2154_v32 = vmul.f32 0.2, %v2130_v36  ;;  %2705 = vmatmul.mubr.bf16.vlgmr.msra.gmra.mxu0 %v4574_v9  ;;  %2758 = vmatmul.mubr.bf16.vlgmr.msra.gmra.mxu1 %v2171_v37  ;;  %v4589_v43 = vpack.c.bf16 %v2168_v42, %v2165_v41  ;;  %v3862_v40 = vld [vmem:[#allocation11 + $0x98] ss:$12 sps:$4 sm:$0xff]  }
 0x57b   : > { %3357 = vmatpush3.bf16.msra.mxu1 %v3859_v30  ;;  %3527 = vmatpush3.bf16.msra.mxu0 %v4537_v28  ;;  %v2163_v44 = vsel %vm2139_vm2, %v2127_v12, %v2151_v35  ;;  %v2164_v48 = vsel %vm2140_vm3, %v2128_v15, %v2152_v39  ;;  %v3866_v28 = vld [vmem:[#allocation11 + $0x128] ss:$12 sps:$4 sm:$0xff]   ;;  %v3875_v63 = vld [vmem:[#allocation11 + $0xe0] ss:$12 sps:$4 sm:$0xff]   ;;  %v4601_v1 = vld [vmem:[%s4695_s17] sm:$0x7] }
 0x57c   : > { %vm2143_vm5 = vcmp.ge.f32.partialorder %v2131_v29, 0.0  ;;  %v2155_v33 = vmul.f32 0.2, %v2131_v29  ;;  %3358 = vmatprep.subr.bf16.mxu1 %v3860_v34  ;;  %3528 = vmatprep.subr.bf16.mxu0 %v3861_v38  ;;  %v2166_v47 = vsel %vm2142_vm4, %v2130_v36, %v2154_v32  ;;  %v2276_v60 = vrot.slane %v4601_v1, %v4467_v54 }
 0x57d   : > { %2767 = vmatprep.mubr.bf16.mxu1 %v4127_v46  ;;  %v2172_v5 = vpack.c.bf16 %v2166_v47, %v2163_v44  ;;  %v3869_v46 = vld [vmem:[#allocation11 + $0x110] ss:$12 sps:$4 sm:$0xff]   ;;  %v2280_v2 = vrot.slane %v4601_v1, %v4470_v55 }
 0x57e   : > { %v2167_v4 = vsel %vm2143_vm5, %v2131_v29, %v2155_v33 }
 0x57f   : > { %v2173_v50 = vpack.c.bf16 %v2167_v4, %v2164_v48  ;;  %3359 = vmatpush3.bf16.msra.mxu1 %v3862_v40  ;;  %3529 = vmatpush3.bf16.msra.mxu0 %v3861_v38 }
 0x580   : > { %3360 = vmatprep.subr.bf16.mxu1 %v3863_v45  ;;  %3530 = vmatprep.subr.bf16.mxu0 %v3864_v49 }
 0x581   : > { %2714 = vmatprep.mubr.bf16.mxu0 %v2173_v50 }
 0x582   : > { %2715 = vmatmul.mubr.bf16.gmra.mxu0 %v2172_v5  ;;  %2768 = vmatmul.mubr.bf16.gmra.mxu1 %v4589_v43 }
 0x583   : > { %3361 = vmatpush3.bf16.msra.mxu1 %v3865_v52  ;;  %3531 = vmatpush3.bf16.msra.mxu0 %v3864_v49 }
 0x584   : > { %2810 = vmatprep.mubr.bf16.mxu1 %v2170_v27  ;;  %3542 = vmatprep.mubr.bf16.mxu0 %v2171_v37 }
 0x585   : > { %3362 = vmatprep.subr.bf16.mxu1 %v3866_v28  ;;  %3532 = vmatprep.subr.bf16.mxu0 %v3867_v10 }
 0x587   : > { %3363 = vmatpush3.bf16.msra.mxu1 %v3868_v53  ;;  %3533 = vmatpush3.bf16.msra.mxu0 %v3867_v10 }
 0x588   : > { %3364 = vmatprep.subr.bf16.mxu1 %v3869_v46  ;;  %3534 = vmatprep.subr.bf16.mxu0 %v3870_v56 }
 0x58b   : > { %3365 = vmatpush3.bf16.msra.mxu1 %v3871_v11  ;;  %3535 = vmatpush3.bf16.msra.mxu0 %v3870_v56 }
 0x58c   : > { %3366 = vmatprep.subr.bf16.mxu1 %v3872_v57  ;;  %3536 = vmatprep.subr.bf16.mxu0 %v3873_v16  ;;  %v2284_v57 = vrot.slane %v4601_v1, %v2116_v31 }
 0x58f   : > { %3367 = vmatpush3.bf16.msra.mxu1 %v3874_v62  ;;  %3537 = vmatpush3.bf16.msra.mxu0 %v3873_v16 }
 0x590   : > { %3368 = vmatprep.subr.bf16.mxu1 %v3875_v63  ;;  %3538 = vmatprep.subr.bf16.mxu0 %v3876_v61 }
 0x593   : > { %3369 = vmatpush3.bf16.msra.mxu1 %v3877_v58  ;;  %3539 = vmatpush3.bf16.msra.mxu0 %v3876_v61 }
 0x594   : > { %3370 = vmatprep.subr.bf16.mxu1 %v3878_v59  ;;  %3540 = vmatprep.subr.bf16.mxu0 %v3879_v0 }
 0x597   : > { %3371 = vmatpush3.bf16.msra.mxu1 %v3880_v17  ;;  %3541 = vmatpush3.bf16.msra.mxu0 %v3879_v0 }
 0x59a   : > { %2811 = vmatmul.mubr.bf16.vlgmr.msra.gmra.mxu1 %v4574_v9  ;;  %3543 = vmatmul.mubr.bf16.vlgmr.msra.gmra.mxu0 %v4589_v43 }
 0x59b   : > { %2818 = vmatprep.mubr.bf16.mxu1 %v2173_v50 }
 0x5a2   : > { %2819 = vmatmul.mubr.bf16.gmra.mxu1 %v2172_v5 }
 0x63a   : > { %v2706_v3 = vpop.f32.mrf.mxu0  ;;  %v2759_v6 = vpop.f32.mrf.mxu1 }
 0x63b   : > { %v2707_v7 = vadd.f32 %v2706_v3, %v2276_v60 }
 0x63c   : > { %v2708_v8 = vpop.f32.mrf.mxu0  ;;  %v2761_v9 = vpop.f32.mrf.mxu1 }
 0x63d   : > { %v2760_v20 = vadd.f32 %v2759_v6, %v2707_v7  ;;  %v2709_v12 = vadd.f32 %v2708_v8, %v2280_v2 }
 0x63e   : > { %v2710_v13 = vpop.f32.mrf.mxu0  ;;  %v2763_v23 = vpop.f32.mrf.mxu1 }
 0x63f   : > { %vm2876_vm6 = vcmp.ge.f32.partialorder %v2760_v20, 0.0  ;;  %v2888_v14 = vmul.f32 0.2, %v2760_v20  ;;  %v2762_v15 = vadd.f32 %v2761_v9, %v2709_v12  ;;  %v2711_v18 = vadd.f32 %v2710_v13, %v2276_v60 }
 0x640   : > { %v2712_v54 = vpop.f32.mrf.mxu0  ;;  %v2765_v19 = vpop.f32.mrf.mxu1 }
 0x641   : > { %v2900_v21 = vsel %vm2876_vm6, %v2760_v20, %v2888_v14  ;;  %vm2877_vm7 = vcmp.ge.f32.partialorder %v2762_v15, 0.0  ;;  %v2889_v55 = vmul.f32 0.2, %v2762_v15  ;;  %v2764_v22 = vadd.f32 %v2763_v23, %v2711_v18 }
 0x642   : > { %2912 = vst [vmem:[%s4610_s27] sm:$0xff] %v2900_v21  ;;  %v2713_v26 = vadd.f32 %v2712_v54, %v2280_v2  ;;  %v2716_v24 = vpop.f32.mrf.mxu0  ;;  %v2769_v25 = vpop.f32.mrf.mxu1 }
 0x643   : > { %v2901_v27 = vsel %vm2877_vm7, %v2762_v15, %v2889_v55  ;;  %vm2879_vm8 = vcmp.ge.f32.partialorder %v2764_v22, 0.0  ;;  %v2891_v30 = vmul.f32 0.2, %v2764_v22  ;;  %v2717_v34 = vadd.f32 %v2716_v24, %v2276_v60 }
 0x644   : > { %2913 = vst [vmem:[%s4610_s27 + $0x8] sm:$0xff] %v2901_v27  ;;  %v2766_v35 = vadd.f32 %v2765_v19, %v2713_v26  ;;  %v2718_v36 = vpop.f32.mrf.mxu0  ;;  %v2771_v37 = vpop.f32.mrf.mxu1 }
 0x645   : > { %v2903_v38 = vsel %vm2879_vm8, %v2764_v22, %v2891_v30  ;;  %v2770_v39 = vadd.f32 %v2769_v25, %v2717_v34  ;;  %v2719_v29 = vadd.f32 %v2718_v36, %v2280_v2 }
 0x646   : > { %2915 = vst [vmem:[%s4610_s27 + $0x18] sm:$0xff] %v2903_v38  ;;  %vm2880_vm9 = vcmp.ge.f32.partialorder %v2766_v35, 0.0  ;;  %v2892_v41 = vmul.f32 0.2, %v2766_v35  ;;  %v2720_v42 = vpop.f32.mrf.mxu0  ;;  %v2773_v40 = vpop.f32.mrf.mxu1 }
 0x647   : > { %vm2882_vm10 = vcmp.ge.f32.partialorder %v2770_v39, 0.0  ;;  %v2894_v32 = vmul.f32 0.2, %v2770_v39  ;;  %v2772_v43 = vadd.f32 %v2771_v37, %v2719_v29  ;;  %v2721_v33 = vadd.f32 %v2720_v42, %v2276_v60 }
 0x648   : > { %v2904_v45 = vsel %vm2880_vm9, %v2766_v35, %v2892_v41  ;;  %v2722_v44 = vpop.f32.mrf.mxu0  ;;  %v2775_v52 = vpop.f32.mrf.mxu1 }
 0x649   : > { %2916 = vst [vmem:[%s4610_s27 + $0x20] sm:$0xff] %v2904_v45  ;;  %v2906_v47 = vsel %vm2882_vm10, %v2770_v39, %v2894_v32  ;;  %vm2883_vm11 = vcmp.ge.f32.partialorder %v2772_v43, 0.0  ;;  %v2895_v48 = vmul.f32 0.2, %v2772_v43  ;;  %v2774_v4 = vadd.f32 %v2773_v40, %v2721_v33 }
 0x64a   : > { %2918 = vst [vmem:[%s4610_s27 + $0x30] sm:$0xff] %v2906_v47  ;;  %v2723_v49 = vadd.f32 %v2722_v44, %v2280_v2 }
 0x64b   : > { %v2907_v5 = vsel %vm2883_vm11, %v2772_v43, %v2895_v48  ;;  %vm2885_vm12 = vcmp.ge.f32.partialorder %v2774_v4, 0.0  ;;  %v2897_v50 = vmul.f32 0.2, %v2774_v4 }
 0x64c   : > { %2919 = vst [vmem:[%s4610_s27 + $0x38] sm:$0xff] %v2907_v5  ;;  %v2776_v28 = vadd.f32 %v2775_v52, %v2723_v49 }
 0x64d   : > { %v2909_v10 = vsel %vm2885_vm12, %v2774_v4, %v2897_v50 }
 0x64e   : > { %2921 = vst [vmem:[%s4610_s27 + $0x48] sm:$0xff] %v2909_v10  ;;  %vm2886_vm13 = vcmp.ge.f32.partialorder %v2776_v28, 0.0  ;;  %v2898_v53 = vmul.f32 0.2, %v2776_v28 }
 0x650   : > { %v2910_v46 = vsel %vm2886_vm13, %v2776_v28, %v2898_v53 }
 0x651   : > { %2922 = vst [vmem:[%s4610_s27 + $0x50] sm:$0xff] %v2910_v46 }
 0x65a   : > { %v3372_v56 = vpop.f32.mrf.mxu1  ;;  %v3544_v11 = vpop.f32.mrf.mxu0 }
 0x65c   : > { %v3373_v16 = vpop.f32.mrf.mxu1  ;;  %v2861_v62 = vpop.f32.mrf.mxu0 }
 0x65d   : > { %v3374_v63 = vadd.f32 %v3373_v16, %v3372_v56 }
 0x65e   : > { %v3375_v61 = vpop.f32.mrf.mxu1  ;;  %v3545_v59 = vpop.f32.mrf.mxu0 }
 0x65f   : > { %v2813_v58 = vadd.f32 %v3374_v63, %v2284_v57 }
 0x660   : > { %v3376_v0 = vpop.f32.mrf.mxu1  ;;  %v2864_v7 = vpop.f32.mrf.mxu0 }
 0x661   : > { %v2862_v17 = vadd.f32 %v2861_v62, %v2813_v58  ;;  %v3377_v60 = vadd.f32 %v3376_v0, %v3375_v61 }
 0x662   : > { %v3378_v2 = vpop.f32.mrf.mxu1 }
 0x663   : > { %vm2878_vm14 = vcmp.ge.f32.partialorder %v2862_v17, 0.0  ;;  %v2890_v3 = vmul.f32 0.2, %v2862_v17  ;;  %v2816_v6 = vadd.f32 %v3377_v60, %v2284_v57 }
 0x664   : > { %v3379_v8 = vpop.f32.mrf.mxu1 }
 0x665   : > { %v2902_v51 = vsel %vm2878_vm14, %v2862_v17, %v2890_v3  ;;  %v2865_v31 = vadd.f32 %v2864_v7, %v2816_v6  ;;  %v3380_v1 = vadd.f32 %v3379_v8, %v3378_v2 }
 0x666   : > { %2914 = vst [vmem:[%s4610_s27 + $0x10] sm:$0xff] %v2902_v51  ;;  %v3381_v9 = vpop.f32.mrf.mxu1 }
 0x667   : > { %vm2881_vm15 = vcmp.ge.f32.partialorder %v2865_v31, 0.0  ;;  %v2893_v20 = vmul.f32 0.2, %v2865_v31  ;;  %v2821_v12 = vadd.f32 %v3380_v1, %v2284_v57 }
 0x668   : > { %v3382_v13 = vpop.f32.mrf.mxu1 }
 0x669   : > { %v2905_v23 = vsel %vm2881_vm15, %v2865_v31, %v2893_v20  ;;  %v2870_v14 = vadd.f32 %v3544_v11, %v2821_v12  ;;  %v3383_v15 = vadd.f32 %v3382_v13, %v3381_v9 }
 0x66a   : > { %2917 = vst [vmem:[%s4610_s27 + $0x28] sm:$0xff] %v2905_v23 }
 0x66b   : > { %vm2884_vm0 = vcmp.ge.f32.partialorder %v2870_v14, 0.0  ;;  %v2896_v18 = vmul.f32 0.2, %v2870_v14  ;;  %v2824_v54 = vadd.f32 %v3383_v15, %v2284_v57 }
 0x66d   : > { %v2908_v19 = vsel %vm2884_vm0, %v2870_v14, %v2896_v18  ;;  %v2873_v21 = vadd.f32 %v3545_v59, %v2824_v54 }
 0x66e   : > { %2920 = vst [vmem:[%s4610_s27 + $0x40] sm:$0xff] %v2908_v19 }
 0x66f   : > { %vm2887_vm1 = vcmp.ge.f32.partialorder %v2873_v21, 0.0  ;;  %v2899_v55 = vmul.f32 0.2, %v2873_v21 }
 0x671   : > { %v2911_v22 = vsel %vm2887_vm1, %v2873_v21, %v2899_v55 }
 0x672   : > { %2923 = vst [vmem:[%s4610_s27 + $0x58] sm:$0xff] %v2911_v22 }
 0x673   : > { %4050 = shalt.err (!%p4047_p3)
}
 0x674   : > { %s4051_s19 = scalar_lea.hbm %s4633_s5, 1536  ;;  %s4055_s27 = scalar_lea.hbm %s4736_s26, 6144 }
 0x675   : > { %p4052_p2 = scmp.ne.s32.totalorder %s4633_s5, %s4051_s19  ;;  %p4056_p7 = scmp.lt.s32.totalorder %s4633_s5, %s4736_s26 }
 0x676   : > { %p4057_p8 = scmp.lt.s32.totalorder %s4055_s27, %s4051_s19 }
 0x677   : > { %p4053_p4 = pnand %p4052_p2, %p4737_p5 }
 0x678   : > { %p4058_p11 = por %p4057_p8, %p4056_p7 }
 0x679   : > { %p4054_p12 = pneg %p4053_p4 }
 0x67b   : > { %p4059_p6 = pnand %p4058_p11, %p4054_p12 }
 0x67d   : > { %4062 = shalt.err (!%p4059_p6)
}
 0x67e   : > { %s4129_s22 = smov 384   ;;  %s4130_s18 = smov 24  }
 0x67f   : > { %3573 = dma.vmem_to_hbm [thread:$0]  (%p4737_p5), %s4628_s23, 1536, %s4633_s5, %s4638_s0, %s4129_s22, %s4129_s22, %s4130_s18  }
 0x680 PF: > { %s4738_s1 = sld [smem:[#allocation21_spill]] }
 0x681   : > { %s4739_s24 = sld [smem:[#allocation19_spill]] }
 0x682   : > { %s4740_s21 = sld [smem:[#allocation24_spill]] }
 0x686   : > { %p3610_p10 = scmp.ge.s32.totalorder %s4738_s1, 2 }
 0x687   : > { %s2954_s29 = sand.u32 1, %s4739_s24  }
 0x688   : > { %p4741_p9 = scmp.ne.s32.totalorder %s4740_s21, 0  ;;  %s2955_s19 = scalar_lea.sflag [#allocation4], %s2954_s29 }
 0x68a   : > { %p3595_p0 = pnand %p3610_p10, %p4741_p9 }
 0x68c   : > { %p3596_p1 = pneg %p3595_p0 }
 0x68e   : > { %4096 = dma.done.wait (%p3596_p1), %s2955_s19, 1536  }
 0x68f   : > { %4098 = vsyncadd (%p3596_p1), %s2955_s19, 4294965760  ;;  %s4742_s30 = sld [smem:[#allocation22_spill]]  ;;  %s4745_s27 = smov %s4105_s28 }
 0x690   : > { %s4743_s20 = sld [smem:[#allocation20_spill]] }
 0x691   : > { %s4744_s29 = sld [smem:[#allocation23_spill]] }
 0x695   : > { %p32_p13 = scmp.ge.s32.totalorder %s4742_s30, 6  }
 0x696   : > { %s4746_s28 = smov %s4743_s20 }
 0x697   :  { %34 = sbr.rel (!%p32_p13) target bundleno = 13 (0xd), region = 158 }
 0x69c   :  { %2960 = vsyncpa [#allocation3], 1 }
 0x69d   :  { %2962 = vsyncpa [#allocation3 + $0x1], 1 }
 0x69e   :  { %2963 = vsyncpa [#allocation6], 1 }
 0x69f   :  { %2964 = vsyncpa [#allocation9], 1 }
 0x6a0   :  { %2965 = vsyncpa [#allocation12], 1 }
 0x6a1   :  { %2966 = vsyncpa [#allocation4], 1 }
 0x6a2   :  { %2968 = vsyncpa [#allocation4 + $0x1], 1 }

</bundles_post_ra>
